<compile_context>
chip_gen: v7x
topology: tpu7x:2x2x1
jax: 0.10.0
libtpu: 0.0.40
codegen_flags: <defaults>
</compile_context>

<pallas_src>
import math

import jax
import jax.numpy as jnp
from jax.experimental import pallas as pl
from jax.experimental.pallas import tpu as pltpu

# ----- small ViT config (stand-in for ViTConfig / google/vit-base) -----------
HIDDEN = 32          # config.hidden_size
HEADS = 4
HEAD_DIM = HIDDEN // HEADS
LAYERS = 2
INTERMEDIATE = 64
PATCH = 8
IMG = 16
CHANNELS = 3
NUM_LABELS = 8
EPS = 1e-12          # ViT layer_norm_eps

N_PATCH = (IMG // PATCH) ** 2        # 4 patches
SEQ = N_PATCH + 1                    # 5 tokens (CLS + patches)
S_PAD = 8                            # padded to a sublane multiple
FEAT = CHANNELS * PATCH * PATCH      # flattened patch features (192)
AUG = FEAT + 2                       # + CLS indicator + patch-bias indicator


# =============================== fused kernel =================================

def _vit_kernel(x_ref, pos_ref, w_aug_ref,
                ln1_g_ref, ln1_b_ref, wqkv_ref, bqkv_ref, wo_ref, bo_ref,
                ln2_g_ref, ln2_b_ref, w1_ref, b1_ref, w2_ref, b2_ref,
                lnf_g_ref, lnf_b_ref, cls_w_ref, cls_b_ref, out_ref):
    """Whole ViT forward for one image (one grid step == one batch element)."""
    f32 = jnp.float32

    def layer_norm(x, g, b):
        mu = jnp.mean(x, axis=-1, keepdims=True)
        var = jnp.mean((x - mu) ** 2, axis=-1, keepdims=True)
        return (x - mu) * jax.lax.rsqrt(var + EPS) * g + b

    # Patch embedding, CLS token and conv bias collapsed into a single matmul
    # on the augmented input, then position embeddings (zero on padded rows).
    h = jnp.dot(x_ref[0], w_aug_ref[...], preferred_element_type=f32)
    h = h + pos_ref[...]                                   # (S_PAD, HIDDEN)

    # Additive mask removing the padded key positions (computed once).
    col = jax.lax.broadcasted_iota(jnp.int32, (S_PAD, S_PAD), 1)
    key_mask = jnp.where(col < SEQ, 0.0, -1e30).astype(f32)

    scale = 1.0 / math.sqrt(HEAD_DIM)

    for l in range(LAYERS):                                # static unroll
        # ---- self-attention block (pre-norm, as in HF ViT) ----
        ln1 = layer_norm(h, ln1_g_ref[l], ln1_b_ref[l])
        qkv = jnp.dot(ln1, wqkv_ref[l], preferred_element_type=f32) + bqkv_ref[l]
        wo_l = wo_ref[l]
        attn = jnp.zeros((S_PAD, HIDDEN), f32)
        for hd in range(HEADS):                            # static unroll
            lo = hd * HEAD_DIM
            q = qkv[:, lo:lo + HEAD_DIM] * scale           # scale folded into q
            k = qkv[:, HIDDEN + lo:HIDDEN + lo + HEAD_DIM]
            v = qkv[:, 2 * HIDDEN + lo:2 * HIDDEN + lo + HEAD_DIM]
            # q @ k^T without materializing an explicit transpose.
            s = jax.lax.dot_general(q, k, (((1,), (1,)), ((), ())),
                                    preferred_element_type=f32)
            s = s + key_mask
            m = jnp.max(s, axis=-1, keepdims=True)
            p = jnp.exp(s - m)
            p = p * pl.reciprocal(jnp.sum(p, axis=-1, keepdims=True), approx=True)
            ctx = jnp.dot(p, v, preferred_element_type=f32)        # (S_PAD, Dh)
            # Fold the head directly into the output projection (no concat).
            attn = attn + jnp.dot(ctx, wo_l[lo:lo + HEAD_DIM, :],
                                  preferred_element_type=f32)
        h = h + attn + bo_ref[l]                           # fused residual add

        # ---- MLP block (pre-norm) ----
        ln2 = layer_norm(h, ln2_g_ref[l], ln2_b_ref[l])
        ff = jnp.dot(ln2, w1_ref[l], preferred_element_type=f32) + b1_ref[l]
        # TODO(synk): HF ViT uses exact (erf) GELU; tanh approximation used for
        # robust Mosaic lowering (numerically ~1e-3 close).
        ff = jax.nn.gelu(ff, approximate=True)
        h = h + jnp.dot(ff, w2_ref[l], preferred_element_type=f32) + b2_ref[l]

    # ---- final LayerNorm only on the CLS row, then the classifier ----
    cls_tok = layer_norm(h[0:1, :], lnf_g_ref[...], lnf_b_ref[...])
    logits = jnp.dot(cls_tok, cls_w_ref[...], preferred_element_type=f32)
    out_ref[0] = (logits + cls_b_ref[...]).astype(out_ref.dtype)


# =============================== parameters ===================================

def init_params(key):
    keys = jax.random.split(key, 8)

    def norm(k, shape, scale=0.02):
        return (scale * jax.random.normal(k, shape)).astype(jnp.float32)

    return {
        # embeddings
        "patch_w": norm(keys[0], (HIDDEN, CHANNELS, PATCH, PATCH)),  # conv (O,C,P,P)
        "patch_b": jnp.zeros((HIDDEN,), jnp.float32),
        "cls": norm(keys[1], (1, 1, HIDDEN)),
        "pos": norm(keys[2], (1, SEQ, HIDDEN)),
        # classifier / final LN
        "lnf_g": jnp.ones((1, HIDDEN), jnp.float32),
        "lnf_b": jnp.zeros((1, HIDDEN), jnp.float32),
        "cls_w": norm(keys[3], (HIDDEN, NUM_LABELS)),
        "cls_b": jnp.zeros((1, NUM_LABELS), jnp.float32),
        # stacked per-layer weights (QKV fused into one matmul)
        "ln1_g": jnp.ones((LAYERS, 1, HIDDEN), jnp.float32),
        "ln1_b": jnp.zeros((LAYERS, 1, HIDDEN), jnp.float32),
        "wqkv": norm(keys[4], (LAYERS, HIDDEN, 3 * HIDDEN)),
        "bqkv": jnp.zeros((LAYERS, 1, 3 * HIDDEN), jnp.float32),
        "wo": norm(keys[5], (LAYERS, HIDDEN, HIDDEN)),
        "bo": jnp.zeros((LAYERS, 1, HIDDEN), jnp.float32),
        "ln2_g": jnp.ones((LAYERS, 1, HIDDEN), jnp.float32),
        "ln2_b": jnp.zeros((LAYERS, 1, HIDDEN), jnp.float32),
        "w1": norm(keys[6], (LAYERS, HIDDEN, INTERMEDIATE)),
        "b1": jnp.zeros((LAYERS, 1, INTERMEDIATE), jnp.float32),
        "w2": norm(keys[7], (LAYERS, INTERMEDIATE, HIDDEN)),
        "b2": jnp.zeros((LAYERS, 1, HIDDEN), jnp.float32),
    }


# =============================== forward ======================================

def vit_forward(params, x):
    """x: (B, C, H, W) NCHW float32 -> logits (B, NUM_LABELS)."""
    B = x.shape[0]
    nP = IMG // PATCH

    # ---- patchify (pure layout plumbing, stays in XLA) ------------------------
    patches = x.reshape(B, CHANNELS, nP, PATCH, nP, PATCH)
    patches = patches.transpose(0, 2, 4, 1, 3, 5).reshape(B, N_PATCH, FEAT)

    # ---- augmented token matrix: CLS + patch embedding + conv bias == 1 matmul
    x_aug = jnp.zeros((B, S_PAD, AUG), jnp.float32)
    x_aug = x_aug.at[:, 1:1 + N_PATCH, :FEAT].set(patches.astype(jnp.float32))
    x_aug = x_aug.at[:, 0, FEAT].set(1.0)                  # CLS indicator
    x_aug = x_aug.at[:, 1:1 + N_PATCH, FEAT + 1].set(1.0)  # patch-bias indicator

    w_aug = jnp.concatenate([
        params["patch_w"].reshape(HIDDEN, FEAT).T,         # (FEAT, HIDDEN)
        params["cls"].reshape(1, HIDDEN),                  # row FEAT     -> CLS
        params["patch_b"].reshape(1, HIDDEN),              # row FEAT + 1 -> bias
    ], axis=0).astype(jnp.float32)                         # (AUG, HIDDEN)

    pos_pad = jnp.zeros((S_PAD, HIDDEN), jnp.float32)
    pos_pad = pos_pad.at[:SEQ].set(params["pos"].reshape(SEQ, HIDDEN))

    full2 = lambda shape: pl.BlockSpec(shape, lambda i: (0, 0))
    full3 = lambda shape: pl.BlockSpec(shape, lambda i: (0, 0, 0))

    out = pl.pallas_call(
        _vit_kernel,
        out_shape=jax.ShapeDtypeStruct((B, 1, NUM_LABELS), jnp.float32),
        grid=(B,),
        in_specs=[
            pl.BlockSpec((1, S_PAD, AUG), lambda i: (i, 0, 0)),       # x_aug
            full2((S_PAD, HIDDEN)),                                   # pos
            full2((AUG, HIDDEN)),                                     # w_aug
            full3((LAYERS, 1, HIDDEN)),                               # ln1_g
            full3((LAYERS, 1, HIDDEN)),                               # ln1_b
            full3((LAYERS, HIDDEN, 3 * HIDDEN)),                      # wqkv
            full3((LAYERS, 1, 3 * HIDDEN)),                           # bqkv
            full3((LAYERS, HIDDEN, HIDDEN)),                          # wo
            full3((LAYERS, 1, HIDDEN)),                               # bo
            full3((LAYERS, 1, HIDDEN)),                               # ln2_g
            full3((LAYERS, 1, HIDDEN)),                               # ln2_b
            full3((LAYERS, HIDDEN, INTERMEDIATE)),                    # w1
            full3((LAYERS, 1, INTERMEDIATE)),                         # b1
            full3((LAYERS, INTERMEDIATE, HIDDEN)),                    # w2
            full3((LAYERS, 1, HIDDEN)),                               # b2
            full2((1, HIDDEN)),                                       # lnf_g
            full2((1, HIDDEN)),                                       # lnf_b
            full2((HIDDEN, NUM_LABELS)),                              # cls_w
            full2((1, NUM_LABELS)),                                   # cls_b
        ],
        out_specs=pl.BlockSpec((1, 1, NUM_LABELS), lambda i: (i, 0, 0)),
        compiler_params=pltpu.CompilerParams(
            dimension_semantics=("parallel",)),            # 2nd TC on v7x
    )(
        x_aug, pos_pad, w_aug,
        params["ln1_g"], params["ln1_b"], params["wqkv"], params["bqkv"],
        params["wo"], params["bo"], params["ln2_g"], params["ln2_b"],
        params["w1"], params["b1"], params["w2"], params["b2"],
        params["lnf_g"], params["lnf_b"], params["cls_w"], params["cls_b"],
    )
    return out[:, 0, :]                                    # (B, NUM_LABELS)


# =============================== main =========================================

if __name__ == "__main__":
    key = jax.random.PRNGKey(0)
    pkey, xkey = jax.random.split(key)
    params = init_params(pkey)
    x = jax.random.normal(xkey, (2, CHANNELS, IMG, IMG), dtype=jnp.float32)

    logits = jax.jit(vit_forward)(params, x)
    jax.block_until_ready(logits)
    assert logits.shape == (2, NUM_LABELS), logits.shape
    assert bool(jnp.all(jnp.isfinite(logits)))
    print("KERNEL_OK")
</pallas_src>

<mosaic_0001>
module attributes {stable_mosaic.version = 11 : i64} {
  func.func @_vit_kernel(%arg0: i32, %arg1: memref<1x8x194xf32, #tpu.memory_space<vmem>>, %arg2: memref<8x32xf32, #tpu.memory_space<vmem>>, %arg3: memref<194x32xf32, #tpu.memory_space<vmem>>, %arg4: memref<2x1x32xf32, #tpu.memory_space<vmem>>, %arg5: memref<2x1x32xf32, #tpu.memory_space<vmem>>, %arg6: memref<2x32x96xf32, #tpu.memory_space<vmem>>, %arg7: memref<2x1x96xf32, #tpu.memory_space<vmem>>, %arg8: memref<2x32x32xf32, #tpu.memory_space<vmem>>, %arg9: memref<2x1x32xf32, #tpu.memory_space<vmem>>, %arg10: memref<2x1x32xf32, #tpu.memory_space<vmem>>, %arg11: memref<2x1x32xf32, #tpu.memory_space<vmem>>, %arg12: memref<2x32x64xf32, #tpu.memory_space<vmem>>, %arg13: memref<2x1x64xf32, #tpu.memory_space<vmem>>, %arg14: memref<2x64x32xf32, #tpu.memory_space<vmem>>, %arg15: memref<2x1x32xf32, #tpu.memory_space<vmem>>, %arg16: memref<1x32xf32, #tpu.memory_space<vmem>>, %arg17: memref<1x32xf32, #tpu.memory_space<vmem>>, %arg18: memref<32x8xf32, #tpu.memory_space<vmem>>, %arg19: memref<1x8xf32, #tpu.memory_space<vmem>>, %arg20: memref<1x1x8xf32, #tpu.memory_space<vmem>>) attributes {dimension_semantics = [#tpu.dimension_semantics<parallel>], iteration_bounds = array<i64: 2>, scalar_prefetch = 0 : i64, scratch_operands = 0 : i64, tpu.core_type = #tpu.core_type<tc>, window_params = [{transform_indices = @transform_0, window_bounds = array<i64: 1, 8, 194>}, {pipeline_mode = #tpu.pipeline_mode<synchronous>, transform_indices = @transform_1, window_bounds = array<i64: 8, 32>}, {pipeline_mode = #tpu.pipeline_mode<synchronous>, transform_indices = @transform_2, window_bounds = array<i64: 194, 32>}, {pipeline_mode = #tpu.pipeline_mode<synchronous>, transform_indices = @transform_3, window_bounds = array<i64: 2, 1, 32>}, {pipeline_mode = #tpu.pipeline_mode<synchronous>, transform_indices = @transform_4, window_bounds = array<i64: 2, 1, 32>}, {pipeline_mode = #tpu.pipeline_mode<synchronous>, transform_indices = @transform_5, window_bounds = array<i64: 2, 32, 96>}, {pipeline_mode = #tpu.pipeline_mode<synchronous>, transform_indices = @transform_6, window_bounds = array<i64: 2, 1, 96>}, {pipeline_mode = #tpu.pipeline_mode<synchronous>, transform_indices = @transform_7, window_bounds = array<i64: 2, 32, 32>}, {pipeline_mode = #tpu.pipeline_mode<synchronous>, transform_indices = @transform_8, window_bounds = array<i64: 2, 1, 32>}, {pipeline_mode = #tpu.pipeline_mode<synchronous>, transform_indices = @transform_9, window_bounds = array<i64: 2, 1, 32>}, {pipeline_mode = #tpu.pipeline_mode<synchronous>, transform_indices = @transform_10, window_bounds = array<i64: 2, 1, 32>}, {pipeline_mode = #tpu.pipeline_mode<synchronous>, transform_indices = @transform_11, window_bounds = array<i64: 2, 32, 64>}, {pipeline_mode = #tpu.pipeline_mode<synchronous>, transform_indices = @transform_12, window_bounds = array<i64: 2, 1, 64>}, {pipeline_mode = #tpu.pipeline_mode<synchronous>, transform_indices = @transform_13, window_bounds = array<i64: 2, 64, 32>}, {pipeline_mode = #tpu.pipeline_mode<synchronous>, transform_indices = @transform_14, window_bounds = array<i64: 2, 1, 32>}, {pipeline_mode = #tpu.pipeline_mode<synchronous>, transform_indices = @transform_15, window_bounds = array<i64: 1, 32>}, {pipeline_mode = #tpu.pipeline_mode<synchronous>, transform_indices = @transform_16, window_bounds = array<i64: 1, 32>}, {pipeline_mode = #tpu.pipeline_mode<synchronous>, transform_indices = @transform_17, window_bounds = array<i64: 32, 8>}, {pipeline_mode = #tpu.pipeline_mode<synchronous>, transform_indices = @transform_18, window_bounds = array<i64: 1, 8>}, {transform_indices = @transform_19, window_bounds = array<i64: 1, 1, 8>}]} {
    %c0 = arith.constant 0 : index
    %c0_0 = arith.constant 0 : index
    %c0_1 = arith.constant 0 : index
    %0 = vector.load %arg1[%c0, %c0_0, %c0_1] : memref<1x8x194xf32, #tpu.memory_space<vmem>>, vector<1x8x194xf32>
    %1 = vector.shape_cast %0 : vector<1x8x194xf32> to vector<8x194xf32>
    %c0_2 = arith.constant 0 : index
    %c0_3 = arith.constant 0 : index
    %2 = vector.load %arg3[%c0_2, %c0_3] : memref<194x32xf32, #tpu.memory_space<vmem>>, vector<194x32xf32>
    %cst = arith.constant dense<0.000000e+00> : vector<8x32xf32>
    %3 = tpu.matmul %1, %2, %cst {dimension_numbers = #tpu.dot_dimension_numbers<[1], [0], [0], [1], [0, 0, 1, 1], [], []>} : vector<8x194xf32>, vector<194x32xf32>, vector<8x32xf32> -> vector<8x32xf32>
    %c0_4 = arith.constant 0 : index
    %c0_5 = arith.constant 0 : index
    %4 = vector.load %arg2[%c0_4, %c0_5] : memref<8x32xf32, #tpu.memory_space<vmem>>, vector<8x32xf32>
    %5 = arith.addf %3, %4 : vector<8x32xf32>
    %6 = tpu.iota {dimensions = array<i32: 1>} : vector<8x8xi32>
    %c5_i32 = arith.constant 5 : i32
    %7 = vector.broadcast %c5_i32 : i32 to vector<8x8xi32>
    %8 = arith.cmpi slt, %6, %7 : vector<8x8xi32>
    %cst_6 = arith.constant 0.000000e+00 : f32
    %cst_7 = arith.constant -1.000000e+30 : f32
    %9 = vector.broadcast %cst_6 : f32 to vector<8x8xf32>
    %10 = vector.broadcast %cst_7 : f32 to vector<8x8xf32>
    %11 = arith.select %8, %9, %10 : vector<8x8xi1>, vector<8x8xf32>
    %c0_8 = arith.constant 0 : index
    %c0_9 = arith.constant 0 : index
    %c0_10 = arith.constant 0 : index
    %12 = vector.load %arg4[%c0_8, %c0_9, %c0_10] : memref<2x1x32xf32, #tpu.memory_space<vmem>>, vector<1x1x32xf32>
    %13 = vector.shape_cast %12 : vector<1x1x32xf32> to vector<1x32xf32>
    %c0_11 = arith.constant 0 : index
    %c0_12 = arith.constant 0 : index
    %c0_13 = arith.constant 0 : index
    %14 = vector.load %arg5[%c0_11, %c0_12, %c0_13] : memref<2x1x32xf32, #tpu.memory_space<vmem>>, vector<1x1x32xf32>
    %15 = vector.shape_cast %14 : vector<1x1x32xf32> to vector<1x32xf32>
    %cst_14 = arith.constant dense<0.000000e+00> : vector<8xf32>
    %16 = vector.multi_reduction <add>, %5, %cst_14 [1] : vector<8x32xf32> to vector<8xf32>
    %17 = vector.shape_cast %16 : vector<8xf32> to vector<8x1xf32>
    %cst_15 = arith.constant 3.200000e+01 : f32
    %18 = vector.broadcast %cst_15 : f32 to vector<8x1xf32>
    %19 = arith.divf %17, %18 : vector<8x1xf32>
    %20 = vector.broadcast %19 : vector<8x1xf32> to vector<8x32xf32>
    %21 = arith.subf %5, %20 : vector<8x32xf32>
    %22 = arith.mulf %21, %21 : vector<8x32xf32>
    %cst_16 = arith.constant dense<0.000000e+00> : vector<8xf32>
    %23 = vector.multi_reduction <add>, %22, %cst_16 [1] : vector<8x32xf32> to vector<8xf32>
    %24 = vector.shape_cast %23 : vector<8xf32> to vector<8x1xf32>
    %cst_17 = arith.constant 3.200000e+01 : f32
    %25 = vector.broadcast %cst_17 : f32 to vector<8x1xf32>
    %26 = arith.divf %24, %25 : vector<8x1xf32>
    %27 = vector.broadcast %19 : vector<8x1xf32> to vector<8x32xf32>
    %28 = arith.subf %5, %27 : vector<8x32xf32>
    %cst_18 = arith.constant 9.99999996E-13 : f32
    %29 = vector.broadcast %cst_18 : f32 to vector<8x1xf32>
    %30 = arith.addf %26, %29 : vector<8x1xf32>
    %31 = math.rsqrt %30 : vector<8x1xf32>
    %32 = vector.broadcast %31 : vector<8x1xf32> to vector<8x32xf32>
    %33 = arith.mulf %28, %32 : vector<8x32xf32>
    %34 = vector.broadcast %13 : vector<1x32xf32> to vector<8x32xf32>
    %35 = arith.mulf %33, %34 : vector<8x32xf32>
    %36 = vector.broadcast %15 : vector<1x32xf32> to vector<8x32xf32>
    %37 = arith.addf %35, %36 : vector<8x32xf32>
    %c0_19 = arith.constant 0 : index
    %c0_20 = arith.constant 0 : index
    %c0_21 = arith.constant 0 : index
    %38 = vector.load %arg6[%c0_19, %c0_20, %c0_21] : memref<2x32x96xf32, #tpu.memory_space<vmem>>, vector<1x32x96xf32>
    %39 = vector.shape_cast %38 : vector<1x32x96xf32> to vector<32x96xf32>
    %cst_22 = arith.constant dense<0.000000e+00> : vector<8x96xf32>
    %40 = tpu.matmul %37, %39, %cst_22 {dimension_numbers = #tpu.dot_dimension_numbers<[1], [0], [0], [1], [0, 0, 1, 1], [], []>} : vector<8x32xf32>, vector<32x96xf32>, vector<8x96xf32> -> vector<8x96xf32>
    %c0_23 = arith.constant 0 : index
    %c0_24 = arith.constant 0 : index
    %c0_25 = arith.constant 0 : index
    %41 = vector.load %arg7[%c0_23, %c0_24, %c0_25] : memref<2x1x96xf32, #tpu.memory_space<vmem>>, vector<1x1x96xf32>
    %42 = vector.shape_cast %41 : vector<1x1x96xf32> to vector<1x96xf32>
    %43 = vector.broadcast %42 : vector<1x96xf32> to vector<8x96xf32>
    %44 = arith.addf %40, %43 : vector<8x96xf32>
    %c0_26 = arith.constant 0 : index
    %c0_27 = arith.constant 0 : index
    %c0_28 = arith.constant 0 : index
    %45 = vector.load %arg8[%c0_26, %c0_27, %c0_28] : memref<2x32x32xf32, #tpu.memory_space<vmem>>, vector<1x32x32xf32>
    %46 = vector.shape_cast %45 : vector<1x32x32xf32> to vector<32x32xf32>
    %cst_29 = arith.constant 0.000000e+00 : f32
    %47 = vector.broadcast %cst_29 : f32 to vector<8x32xf32>
    %48 = vector.extract_strided_slice %44 {offsets = [0, 0], sizes = [8, 8], strides = [1, 1]} : vector<8x96xf32> to vector<8x8xf32>
    %cst_30 = arith.constant 0.353553385 : f32
    %49 = vector.broadcast %cst_30 : f32 to vector<8x8xf32>
    %50 = arith.mulf %48, %49 : vector<8x8xf32>
    %51 = vector.extract_strided_slice %44 {offsets = [0, 32], sizes = [8, 8], strides = [1, 1]} : vector<8x96xf32> to vector<8x8xf32>
    %52 = vector.extract_strided_slice %44 {offsets = [0, 64], sizes = [8, 8], strides = [1, 1]} : vector<8x96xf32> to vector<8x8xf32>
    %cst_31 = arith.constant dense<0.000000e+00> : vector<8x8xf32>
    %53 = tpu.matmul %50, %51, %cst_31 {dimension_numbers = #tpu.dot_dimension_numbers<[1], [1], [0], [0], [0, 0, 1, 0], [], []>} : vector<8x8xf32>, vector<8x8xf32>, vector<8x8xf32> -> vector<8x8xf32>
    %54 = arith.addf %53, %11 : vector<8x8xf32>
    %cst_32 = arith.constant dense<0xFF800000> : vector<8xf32>
    %55 = vector.multi_reduction <maximumf>, %54, %cst_32 [1] : vector<8x8xf32> to vector<8xf32>
    %56 = vector.shape_cast %55 : vector<8xf32> to vector<8x1xf32>
    %57 = vector.broadcast %56 : vector<8x1xf32> to vector<8x8xf32>
    %58 = arith.subf %54, %57 : vector<8x8xf32>
    %59 = math.exp %58 : vector<8x8xf32>
    %cst_33 = arith.constant dense<0.000000e+00> : vector<8xf32>
    %60 = vector.multi_reduction <add>, %59, %cst_33 [1] : vector<8x8xf32> to vector<8xf32>
    %61 = vector.shape_cast %60 : vector<8xf32> to vector<8x1xf32>
    %62 = tpu.reciprocal %61 {approx = true} : vector<8x1xf32> -> vector<8x1xf32>
    %63 = vector.broadcast %62 : vector<8x1xf32> to vector<8x8xf32>
    %64 = arith.mulf %59, %63 : vector<8x8xf32>
    %cst_34 = arith.constant dense<0.000000e+00> : vector<8x8xf32>
    %65 = tpu.matmul %64, %52, %cst_34 {dimension_numbers = #tpu.dot_dimension_numbers<[1], [0], [0], [1], [0, 0, 1, 1], [], []>} : vector<8x8xf32>, vector<8x8xf32>, vector<8x8xf32> -> vector<8x8xf32>
    %66 = vector.extract_strided_slice %46 {offsets = [0, 0], sizes = [8, 32], strides = [1, 1]} : vector<32x32xf32> to vector<8x32xf32>
    %cst_35 = arith.constant dense<0.000000e+00> : vector<8x32xf32>
    %67 = tpu.matmul %65, %66, %cst_35 {dimension_numbers = #tpu.dot_dimension_numbers<[1], [0], [0], [1], [0, 0, 1, 1], [], []>} : vector<8x8xf32>, vector<8x32xf32>, vector<8x32xf32> -> vector<8x32xf32>
    %68 = arith.addf %47, %67 : vector<8x32xf32>
    %69 = vector.extract_strided_slice %44 {offsets = [0, 8], sizes = [8, 8], strides = [1, 1]} : vector<8x96xf32> to vector<8x8xf32>
    %cst_36 = arith.constant 0.353553385 : f32
    %70 = vector.broadcast %cst_36 : f32 to vector<8x8xf32>
    %71 = arith.mulf %69, %70 : vector<8x8xf32>
    %72 = vector.extract_strided_slice %44 {offsets = [0, 40], sizes = [8, 8], strides = [1, 1]} : vector<8x96xf32> to vector<8x8xf32>
    %73 = vector.extract_strided_slice %44 {offsets = [0, 72], sizes = [8, 8], strides = [1, 1]} : vector<8x96xf32> to vector<8x8xf32>
    %cst_37 = arith.constant dense<0.000000e+00> : vector<8x8xf32>
    %74 = tpu.matmul %71, %72, %cst_37 {dimension_numbers = #tpu.dot_dimension_numbers<[1], [1], [0], [0], [0, 0, 1, 0], [], []>} : vector<8x8xf32>, vector<8x8xf32>, vector<8x8xf32> -> vector<8x8xf32>
    %75 = arith.addf %74, %11 : vector<8x8xf32>
    %cst_38 = arith.constant dense<0xFF800000> : vector<8xf32>
    %76 = vector.multi_reduction <maximumf>, %75, %cst_38 [1] : vector<8x8xf32> to vector<8xf32>
    %77 = vector.shape_cast %76 : vector<8xf32> to vector<8x1xf32>
    %78 = vector.broadcast %77 : vector<8x1xf32> to vector<8x8xf32>
    %79 = arith.subf %75, %78 : vector<8x8xf32>
    %80 = math.exp %79 : vector<8x8xf32>
    %cst_39 = arith.constant dense<0.000000e+00> : vector<8xf32>
    %81 = vector.multi_reduction <add>, %80, %cst_39 [1] : vector<8x8xf32> to vector<8xf32>
    %82 = vector.shape_cast %81 : vector<8xf32> to vector<8x1xf32>
    %83 = tpu.reciprocal %82 {approx = true} : vector<8x1xf32> -> vector<8x1xf32>
    %84 = vector.broadcast %83 : vector<8x1xf32> to vector<8x8xf32>
    %85 = arith.mulf %80, %84 : vector<8x8xf32>
    %cst_40 = arith.constant dense<0.000000e+00> : vector<8x8xf32>
    %86 = tpu.matmul %85, %73, %cst_40 {dimension_numbers = #tpu.dot_dimension_numbers<[1], [0], [0], [1], [0, 0, 1, 1], [], []>} : vector<8x8xf32>, vector<8x8xf32>, vector<8x8xf32> -> vector<8x8xf32>
    %87 = vector.extract_strided_slice %46 {offsets = [8, 0], sizes = [8, 32], strides = [1, 1]} : vector<32x32xf32> to vector<8x32xf32>
    %cst_41 = arith.constant dense<0.000000e+00> : vector<8x32xf32>
    %88 = tpu.matmul %86, %87, %cst_41 {dimension_numbers = #tpu.dot_dimension_numbers<[1], [0], [0], [1], [0, 0, 1, 1], [], []>} : vector<8x8xf32>, vector<8x32xf32>, vector<8x32xf32> -> vector<8x32xf32>
    %89 = arith.addf %68, %88 : vector<8x32xf32>
    %90 = vector.extract_strided_slice %44 {offsets = [0, 16], sizes = [8, 8], strides = [1, 1]} : vector<8x96xf32> to vector<8x8xf32>
    %cst_42 = arith.constant 0.353553385 : f32
    %91 = vector.broadcast %cst_42 : f32 to vector<8x8xf32>
    %92 = arith.mulf %90, %91 : vector<8x8xf32>
    %93 = vector.extract_strided_slice %44 {offsets = [0, 48], sizes = [8, 8], strides = [1, 1]} : vector<8x96xf32> to vector<8x8xf32>
    %94 = vector.extract_strided_slice %44 {offsets = [0, 80], sizes = [8, 8], strides = [1, 1]} : vector<8x96xf32> to vector<8x8xf32>
    %cst_43 = arith.constant dense<0.000000e+00> : vector<8x8xf32>
    %95 = tpu.matmul %92, %93, %cst_43 {dimension_numbers = #tpu.dot_dimension_numbers<[1], [1], [0], [0], [0, 0, 1, 0], [], []>} : vector<8x8xf32>, vector<8x8xf32>, vector<8x8xf32> -> vector<8x8xf32>
    %96 = arith.addf %95, %11 : vector<8x8xf32>
    %cst_44 = arith.constant dense<0xFF800000> : vector<8xf32>
    %97 = vector.multi_reduction <maximumf>, %96, %cst_44 [1] : vector<8x8xf32> to vector<8xf32>
    %98 = vector.shape_cast %97 : vector<8xf32> to vector<8x1xf32>
    %99 = vector.broadcast %98 : vector<8x1xf32> to vector<8x8xf32>
    %100 = arith.subf %96, %99 : vector<8x8xf32>
    %101 = math.exp %100 : vector<8x8xf32>
    %cst_45 = arith.constant dense<0.000000e+00> : vector<8xf32>
    %102 = vector.multi_reduction <add>, %101, %cst_45 [1] : vector<8x8xf32> to vector<8xf32>
    %103 = vector.shape_cast %102 : vector<8xf32> to vector<8x1xf32>
    %104 = tpu.reciprocal %103 {approx = true} : vector<8x1xf32> -> vector<8x1xf32>
    %105 = vector.broadcast %104 : vector<8x1xf32> to vector<8x8xf32>
    %106 = arith.mulf %101, %105 : vector<8x8xf32>
    %cst_46 = arith.constant dense<0.000000e+00> : vector<8x8xf32>
    %107 = tpu.matmul %106, %94, %cst_46 {dimension_numbers = #tpu.dot_dimension_numbers<[1], [0], [0], [1], [0, 0, 1, 1], [], []>} : vector<8x8xf32>, vector<8x8xf32>, vector<8x8xf32> -> vector<8x8xf32>
    %108 = vector.extract_strided_slice %46 {offsets = [16, 0], sizes = [8, 32], strides = [1, 1]} : vector<32x32xf32> to vector<8x32xf32>
    %cst_47 = arith.constant dense<0.000000e+00> : vector<8x32xf32>
    %109 = tpu.matmul %107, %108, %cst_47 {dimension_numbers = #tpu.dot_dimension_numbers<[1], [0], [0], [1], [0, 0, 1, 1], [], []>} : vector<8x8xf32>, vector<8x32xf32>, vector<8x32xf32> -> vector<8x32xf32>
    %110 = arith.addf %89, %109 : vector<8x32xf32>
    %111 = vector.extract_strided_slice %44 {offsets = [0, 24], sizes = [8, 8], strides = [1, 1]} : vector<8x96xf32> to vector<8x8xf32>
    %cst_48 = arith.constant 0.353553385 : f32
    %112 = vector.broadcast %cst_48 : f32 to vector<8x8xf32>
    %113 = arith.mulf %111, %112 : vector<8x8xf32>
    %114 = vector.extract_strided_slice %44 {offsets = [0, 56], sizes = [8, 8], strides = [1, 1]} : vector<8x96xf32> to vector<8x8xf32>
    %115 = vector.extract_strided_slice %44 {offsets = [0, 88], sizes = [8, 8], strides = [1, 1]} : vector<8x96xf32> to vector<8x8xf32>
    %cst_49 = arith.constant dense<0.000000e+00> : vector<8x8xf32>
    %116 = tpu.matmul %113, %114, %cst_49 {dimension_numbers = #tpu.dot_dimension_numbers<[1], [1], [0], [0], [0, 0, 1, 0], [], []>} : vector<8x8xf32>, vector<8x8xf32>, vector<8x8xf32> -> vector<8x8xf32>
    %117 = arith.addf %116, %11 : vector<8x8xf32>
    %cst_50 = arith.constant dense<0xFF800000> : vector<8xf32>
    %118 = vector.multi_reduction <maximumf>, %117, %cst_50 [1] : vector<8x8xf32> to vector<8xf32>
    %119 = vector.shape_cast %118 : vector<8xf32> to vector<8x1xf32>
    %120 = vector.broadcast %119 : vector<8x1xf32> to vector<8x8xf32>
    %121 = arith.subf %117, %120 : vector<8x8xf32>
    %122 = math.exp %121 : vector<8x8xf32>
    %cst_51 = arith.constant dense<0.000000e+00> : vector<8xf32>
    %123 = vector.multi_reduction <add>, %122, %cst_51 [1] : vector<8x8xf32> to vector<8xf32>
    %124 = vector.shape_cast %123 : vector<8xf32> to vector<8x1xf32>
    %125 = tpu.reciprocal %124 {approx = true} : vector<8x1xf32> -> vector<8x1xf32>
    %126 = vector.broadcast %125 : vector<8x1xf32> to vector<8x8xf32>
    %127 = arith.mulf %122, %126 : vector<8x8xf32>
    %cst_52 = arith.constant dense<0.000000e+00> : vector<8x8xf32>
    %128 = tpu.matmul %127, %115, %cst_52 {dimension_numbers = #tpu.dot_dimension_numbers<[1], [0], [0], [1], [0, 0, 1, 1], [], []>} : vector<8x8xf32>, vector<8x8xf32>, vector<8x8xf32> -> vector<8x8xf32>
    %129 = vector.extract_strided_slice %46 {offsets = [24, 0], sizes = [8, 32], strides = [1, 1]} : vector<32x32xf32> to vector<8x32xf32>
    %cst_53 = arith.constant dense<0.000000e+00> : vector<8x32xf32>
    %130 = tpu.matmul %128, %129, %cst_53 {dimension_numbers = #tpu.dot_dimension_numbers<[1], [0], [0], [1], [0, 0, 1, 1], [], []>} : vector<8x8xf32>, vector<8x32xf32>, vector<8x32xf32> -> vector<8x32xf32>
    %131 = arith.addf %110, %130 : vector<8x32xf32>
    %132 = arith.addf %5, %131 : vector<8x32xf32>
    %c0_54 = arith.constant 0 : index
    %c0_55 = arith.constant 0 : index
    %c0_56 = arith.constant 0 : index
    %133 = vector.load %arg9[%c0_54, %c0_55, %c0_56] : memref<2x1x32xf32, #tpu.memory_space<vmem>>, vector<1x1x32xf32>
    %134 = vector.shape_cast %133 : vector<1x1x32xf32> to vector<1x32xf32>
    %135 = vector.broadcast %134 : vector<1x32xf32> to vector<8x32xf32>
    %136 = arith.addf %132, %135 : vector<8x32xf32>
    %c0_57 = arith.constant 0 : index
    %c0_58 = arith.constant 0 : index
    %c0_59 = arith.constant 0 : index
    %137 = vector.load %arg10[%c0_57, %c0_58, %c0_59] : memref<2x1x32xf32, #tpu.memory_space<vmem>>, vector<1x1x32xf32>
    %138 = vector.shape_cast %137 : vector<1x1x32xf32> to vector<1x32xf32>
    %c0_60 = arith.constant 0 : index
    %c0_61 = arith.constant 0 : index
    %c0_62 = arith.constant 0 : index
    %139 = vector.load %arg11[%c0_60, %c0_61, %c0_62] : memref<2x1x32xf32, #tpu.memory_space<vmem>>, vector<1x1x32xf32>
    %140 = vector.shape_cast %139 : vector<1x1x32xf32> to vector<1x32xf32>
    %cst_63 = arith.constant dense<0.000000e+00> : vector<8xf32>
    %141 = vector.multi_reduction <add>, %136, %cst_63 [1] : vector<8x32xf32> to vector<8xf32>
    %142 = vector.shape_cast %141 : vector<8xf32> to vector<8x1xf32>
    %cst_64 = arith.constant 3.200000e+01 : f32
    %143 = vector.broadcast %cst_64 : f32 to vector<8x1xf32>
    %144 = arith.divf %142, %143 : vector<8x1xf32>
    %145 = vector.broadcast %144 : vector<8x1xf32> to vector<8x32xf32>
    %146 = arith.subf %136, %145 : vector<8x32xf32>
    %147 = arith.mulf %146, %146 : vector<8x32xf32>
    %cst_65 = arith.constant dense<0.000000e+00> : vector<8xf32>
    %148 = vector.multi_reduction <add>, %147, %cst_65 [1] : vector<8x32xf32> to vector<8xf32>
    %149 = vector.shape_cast %148 : vector<8xf32> to vector<8x1xf32>
    %cst_66 = arith.constant 3.200000e+01 : f32
    %150 = vector.broadcast %cst_66 : f32 to vector<8x1xf32>
    %151 = arith.divf %149, %150 : vector<8x1xf32>
    %152 = vector.broadcast %144 : vector<8x1xf32> to vector<8x32xf32>
    %153 = arith.subf %136, %152 : vector<8x32xf32>
    %cst_67 = arith.constant 9.99999996E-13 : f32
    %154 = vector.broadcast %cst_67 : f32 to vector<8x1xf32>
    %155 = arith.addf %151, %154 : vector<8x1xf32>
    %156 = math.rsqrt %155 : vector<8x1xf32>
    %157 = vector.broadcast %156 : vector<8x1xf32> to vector<8x32xf32>
    %158 = arith.mulf %153, %157 : vector<8x32xf32>
    %159 = vector.broadcast %138 : vector<1x32xf32> to vector<8x32xf32>
    %160 = arith.mulf %158, %159 : vector<8x32xf32>
    %161 = vector.broadcast %140 : vector<1x32xf32> to vector<8x32xf32>
    %162 = arith.addf %160, %161 : vector<8x32xf32>
    %c0_68 = arith.constant 0 : index
    %c0_69 = arith.constant 0 : index
    %c0_70 = arith.constant 0 : index
    %163 = vector.load %arg12[%c0_68, %c0_69, %c0_70] : memref<2x32x64xf32, #tpu.memory_space<vmem>>, vector<1x32x64xf32>
    %164 = vector.shape_cast %163 : vector<1x32x64xf32> to vector<32x64xf32>
    %cst_71 = arith.constant dense<0.000000e+00> : vector<8x64xf32>
    %165 = tpu.matmul %162, %164, %cst_71 {dimension_numbers = #tpu.dot_dimension_numbers<[1], [0], [0], [1], [0, 0, 1, 1], [], []>} : vector<8x32xf32>, vector<32x64xf32>, vector<8x64xf32> -> vector<8x64xf32>
    %c0_72 = arith.constant 0 : index
    %c0_73 = arith.constant 0 : index
    %c0_74 = arith.constant 0 : index
    %166 = vector.load %arg13[%c0_72, %c0_73, %c0_74] : memref<2x1x64xf32, #tpu.memory_space<vmem>>, vector<1x1x64xf32>
    %167 = vector.shape_cast %166 : vector<1x1x64xf32> to vector<1x64xf32>
    %168 = vector.broadcast %167 : vector<1x64xf32> to vector<8x64xf32>
    %169 = arith.addf %165, %168 : vector<8x64xf32>
    %170 = arith.mulf %169, %169 : vector<8x64xf32>
    %171 = arith.mulf %169, %170 : vector<8x64xf32>
    %cst_75 = arith.constant 4.471500e-02 : f32
    %172 = vector.broadcast %cst_75 : f32 to vector<8x64xf32>
    %173 = arith.mulf %172, %171 : vector<8x64xf32>
    %174 = arith.addf %169, %173 : vector<8x64xf32>
    %cst_76 = arith.constant 0.797884583 : f32
    %175 = vector.broadcast %cst_76 : f32 to vector<8x64xf32>
    %176 = arith.mulf %175, %174 : vector<8x64xf32>
    %177 = math.tanh %176 : vector<8x64xf32>
    %cst_77 = arith.constant 1.000000e+00 : f32
    %178 = vector.broadcast %cst_77 : f32 to vector<8x64xf32>
    %179 = arith.addf %178, %177 : vector<8x64xf32>
    %cst_78 = arith.constant 5.000000e-01 : f32
    %180 = vector.broadcast %cst_78 : f32 to vector<8x64xf32>
    %181 = arith.mulf %180, %179 : vector<8x64xf32>
    %182 = arith.mulf %169, %181 : vector<8x64xf32>
    %c0_79 = arith.constant 0 : index
    %c0_80 = arith.constant 0 : index
    %c0_81 = arith.constant 0 : index
    %183 = vector.load %arg14[%c0_79, %c0_80, %c0_81] : memref<2x64x32xf32, #tpu.memory_space<vmem>>, vector<1x64x32xf32>
    %184 = vector.shape_cast %183 : vector<1x64x32xf32> to vector<64x32xf32>
    %cst_82 = arith.constant dense<0.000000e+00> : vector<8x32xf32>
    %185 = tpu.matmul %182, %184, %cst_82 {dimension_numbers = #tpu.dot_dimension_numbers<[1], [0], [0], [1], [0, 0, 1, 1], [], []>} : vector<8x64xf32>, vector<64x32xf32>, vector<8x32xf32> -> vector<8x32xf32>
    %186 = arith.addf %136, %185 : vector<8x32xf32>
    %c0_83 = arith.constant 0 : index
    %c0_84 = arith.constant 0 : index
    %c0_85 = arith.constant 0 : index
    %187 = vector.load %arg15[%c0_83, %c0_84, %c0_85] : memref<2x1x32xf32, #tpu.memory_space<vmem>>, vector<1x1x32xf32>
    %188 = vector.shape_cast %187 : vector<1x1x32xf32> to vector<1x32xf32>
    %189 = vector.broadcast %188 : vector<1x32xf32> to vector<8x32xf32>
    %190 = arith.addf %186, %189 : vector<8x32xf32>
    %c1 = arith.constant 1 : index
    %c0_86 = arith.constant 0 : index
    %c0_87 = arith.constant 0 : index
    %191 = vector.load %arg4[%c1, %c0_86, %c0_87] : memref<2x1x32xf32, #tpu.memory_space<vmem>>, vector<1x1x32xf32>
    %192 = vector.shape_cast %191 : vector<1x1x32xf32> to vector<1x32xf32>
    %c1_88 = arith.constant 1 : index
    %c0_89 = arith.constant 0 : index
    %c0_90 = arith.constant 0 : index
    %193 = vector.load %arg5[%c1_88, %c0_89, %c0_90] : memref<2x1x32xf32, #tpu.memory_space<vmem>>, vector<1x1x32xf32>
    %194 = vector.shape_cast %193 : vector<1x1x32xf32> to vector<1x32xf32>
    %cst_91 = arith.constant dense<0.000000e+00> : vector<8xf32>
    %195 = vector.multi_reduction <add>, %190, %cst_91 [1] : vector<8x32xf32> to vector<8xf32>
    %196 = vector.shape_cast %195 : vector<8xf32> to vector<8x1xf32>
    %cst_92 = arith.constant 3.200000e+01 : f32
    %197 = vector.broadcast %cst_92 : f32 to vector<8x1xf32>
    %198 = arith.divf %196, %197 : vector<8x1xf32>
    %199 = vector.broadcast %198 : vector<8x1xf32> to vector<8x32xf32>
    %200 = arith.subf %190, %199 : vector<8x32xf32>
    %201 = arith.mulf %200, %200 : vector<8x32xf32>
    %cst_93 = arith.constant dense<0.000000e+00> : vector<8xf32>
    %202 = vector.multi_reduction <add>, %201, %cst_93 [1] : vector<8x32xf32> to vector<8xf32>
    %203 = vector.shape_cast %202 : vector<8xf32> to vector<8x1xf32>
    %cst_94 = arith.constant 3.200000e+01 : f32
    %204 = vector.broadcast %cst_94 : f32 to vector<8x1xf32>
    %205 = arith.divf %203, %204 : vector<8x1xf32>
    %206 = vector.broadcast %198 : vector<8x1xf32> to vector<8x32xf32>
    %207 = arith.subf %190, %206 : vector<8x32xf32>
    %cst_95 = arith.constant 9.99999996E-13 : f32
    %208 = vector.broadcast %cst_95 : f32 to vector<8x1xf32>
    %209 = arith.addf %205, %208 : vector<8x1xf32>
    %210 = math.rsqrt %209 : vector<8x1xf32>
    %211 = vector.broadcast %210 : vector<8x1xf32> to vector<8x32xf32>
    %212 = arith.mulf %207, %211 : vector<8x32xf32>
    %213 = vector.broadcast %192 : vector<1x32xf32> to vector<8x32xf32>
    %214 = arith.mulf %212, %213 : vector<8x32xf32>
    %215 = vector.broadcast %194 : vector<1x32xf32> to vector<8x32xf32>
    %216 = arith.addf %214, %215 : vector<8x32xf32>
    %c1_96 = arith.constant 1 : index
    %c0_97 = arith.constant 0 : index
    %c0_98 = arith.constant 0 : index
    %217 = vector.load %arg6[%c1_96, %c0_97, %c0_98] : memref<2x32x96xf32, #tpu.memory_space<vmem>>, vector<1x32x96xf32>
    %218 = vector.shape_cast %217 : vector<1x32x96xf32> to vector<32x96xf32>
    %cst_99 = arith.constant dense<0.000000e+00> : vector<8x96xf32>
    %219 = tpu.matmul %216, %218, %cst_99 {dimension_numbers = #tpu.dot_dimension_numbers<[1], [0], [0], [1], [0, 0, 1, 1], [], []>} : vector<8x32xf32>, vector<32x96xf32>, vector<8x96xf32> -> vector<8x96xf32>
    %c1_100 = arith.constant 1 : index
    %c0_101 = arith.constant 0 : index
    %c0_102 = arith.constant 0 : index
    %220 = vector.load %arg7[%c1_100, %c0_101, %c0_102] : memref<2x1x96xf32, #tpu.memory_space<vmem>>, vector<1x1x96xf32>
    %221 = vector.shape_cast %220 : vector<1x1x96xf32> to vector<1x96xf32>
    %222 = vector.broadcast %221 : vector<1x96xf32> to vector<8x96xf32>
    %223 = arith.addf %219, %222 : vector<8x96xf32>
    %c1_103 = arith.constant 1 : index
    %c0_104 = arith.constant 0 : index
    %c0_105 = arith.constant 0 : index
    %224 = vector.load %arg8[%c1_103, %c0_104, %c0_105] : memref<2x32x32xf32, #tpu.memory_space<vmem>>, vector<1x32x32xf32>
    %225 = vector.shape_cast %224 : vector<1x32x32xf32> to vector<32x32xf32>
    %cst_106 = arith.constant 0.000000e+00 : f32
    %226 = vector.broadcast %cst_106 : f32 to vector<8x32xf32>
    %227 = vector.extract_strided_slice %223 {offsets = [0, 0], sizes = [8, 8], strides = [1, 1]} : vector<8x96xf32> to vector<8x8xf32>
    %cst_107 = arith.constant 0.353553385 : f32
    %228 = vector.broadcast %cst_107 : f32 to vector<8x8xf32>
    %229 = arith.mulf %227, %228 : vector<8x8xf32>
    %230 = vector.extract_strided_slice %223 {offsets = [0, 32], sizes = [8, 8], strides = [1, 1]} : vector<8x96xf32> to vector<8x8xf32>
    %231 = vector.extract_strided_slice %223 {offsets = [0, 64], sizes = [8, 8], strides = [1, 1]} : vector<8x96xf32> to vector<8x8xf32>
    %cst_108 = arith.constant dense<0.000000e+00> : vector<8x8xf32>
    %232 = tpu.matmul %229, %230, %cst_108 {dimension_numbers = #tpu.dot_dimension_numbers<[1], [1], [0], [0], [0, 0, 1, 0], [], []>} : vector<8x8xf32>, vector<8x8xf32>, vector<8x8xf32> -> vector<8x8xf32>
    %233 = arith.addf %232, %11 : vector<8x8xf32>
    %cst_109 = arith.constant dense<0xFF800000> : vector<8xf32>
    %234 = vector.multi_reduction <maximumf>, %233, %cst_109 [1] : vector<8x8xf32> to vector<8xf32>
    %235 = vector.shape_cast %234 : vector<8xf32> to vector<8x1xf32>
    %236 = vector.broadcast %235 : vector<8x1xf32> to vector<8x8xf32>
    %237 = arith.subf %233, %236 : vector<8x8xf32>
    %238 = math.exp %237 : vector<8x8xf32>
    %cst_110 = arith.constant dense<0.000000e+00> : vector<8xf32>
    %239 = vector.multi_reduction <add>, %238, %cst_110 [1] : vector<8x8xf32> to vector<8xf32>
    %240 = vector.shape_cast %239 : vector<8xf32> to vector<8x1xf32>
    %241 = tpu.reciprocal %240 {approx = true} : vector<8x1xf32> -> vector<8x1xf32>
    %242 = vector.broadcast %241 : vector<8x1xf32> to vector<8x8xf32>
    %243 = arith.mulf %238, %242 : vector<8x8xf32>
    %cst_111 = arith.constant dense<0.000000e+00> : vector<8x8xf32>
    %244 = tpu.matmul %243, %231, %cst_111 {dimension_numbers = #tpu.dot_dimension_numbers<[1], [0], [0], [1], [0, 0, 1, 1], [], []>} : vector<8x8xf32>, vector<8x8xf32>, vector<8x8xf32> -> vector<8x8xf32>
    %245 = vector.extract_strided_slice %225 {offsets = [0, 0], sizes = [8, 32], strides = [1, 1]} : vector<32x32xf32> to vector<8x32xf32>
    %cst_112 = arith.constant dense<0.000000e+00> : vector<8x32xf32>
    %246 = tpu.matmul %244, %245, %cst_112 {dimension_numbers = #tpu.dot_dimension_numbers<[1], [0], [0], [1], [0, 0, 1, 1], [], []>} : vector<8x8xf32>, vector<8x32xf32>, vector<8x32xf32> -> vector<8x32xf32>
    %247 = arith.addf %226, %246 : vector<8x32xf32>
    %248 = vector.extract_strided_slice %223 {offsets = [0, 8], sizes = [8, 8], strides = [1, 1]} : vector<8x96xf32> to vector<8x8xf32>
    %cst_113 = arith.constant 0.353553385 : f32
    %249 = vector.broadcast %cst_113 : f32 to vector<8x8xf32>
    %250 = arith.mulf %248, %249 : vector<8x8xf32>
    %251 = vector.extract_strided_slice %223 {offsets = [0, 40], sizes = [8, 8], strides = [1, 1]} : vector<8x96xf32> to vector<8x8xf32>
    %252 = vector.extract_strided_slice %223 {offsets = [0, 72], sizes = [8, 8], strides = [1, 1]} : vector<8x96xf32> to vector<8x8xf32>
    %cst_114 = arith.constant dense<0.000000e+00> : vector<8x8xf32>
    %253 = tpu.matmul %250, %251, %cst_114 {dimension_numbers = #tpu.dot_dimension_numbers<[1], [1], [0], [0], [0, 0, 1, 0], [], []>} : vector<8x8xf32>, vector<8x8xf32>, vector<8x8xf32> -> vector<8x8xf32>
    %254 = arith.addf %253, %11 : vector<8x8xf32>
    %cst_115 = arith.constant dense<0xFF800000> : vector<8xf32>
    %255 = vector.multi_reduction <maximumf>, %254, %cst_115 [1] : vector<8x8xf32> to vector<8xf32>
    %256 = vector.shape_cast %255 : vector<8xf32> to vector<8x1xf32>
    %257 = vector.broadcast %256 : vector<8x1xf32> to vector<8x8xf32>
    %258 = arith.subf %254, %257 : vector<8x8xf32>
    %259 = math.exp %258 : vector<8x8xf32>
    %cst_116 = arith.constant dense<0.000000e+00> : vector<8xf32>
    %260 = vector.multi_reduction <add>, %259, %cst_116 [1] : vector<8x8xf32> to vector<8xf32>
    %261 = vector.shape_cast %260 : vector<8xf32> to vector<8x1xf32>
    %262 = tpu.reciprocal %261 {approx = true} : vector<8x1xf32> -> vector<8x1xf32>
    %263 = vector.broadcast %262 : vector<8x1xf32> to vector<8x8xf32>
    %264 = arith.mulf %259, %263 : vector<8x8xf32>
    %cst_117 = arith.constant dense<0.000000e+00> : vector<8x8xf32>
    %265 = tpu.matmul %264, %252, %cst_117 {dimension_numbers = #tpu.dot_dimension_numbers<[1], [0], [0], [1], [0, 0, 1, 1], [], []>} : vector<8x8xf32>, vector<8x8xf32>, vector<8x8xf32> -> vector<8x8xf32>
    %266 = vector.extract_strided_slice %225 {offsets = [8, 0], sizes = [8, 32], strides = [1, 1]} : vector<32x32xf32> to vector<8x32xf32>
    %cst_118 = arith.constant dense<0.000000e+00> : vector<8x32xf32>
    %267 = tpu.matmul %265, %266, %cst_118 {dimension_numbers = #tpu.dot_dimension_numbers<[1], [0], [0], [1], [0, 0, 1, 1], [], []>} : vector<8x8xf32>, vector<8x32xf32>, vector<8x32xf32> -> vector<8x32xf32>
    %268 = arith.addf %247, %267 : vector<8x32xf32>
    %269 = vector.extract_strided_slice %223 {offsets = [0, 16], sizes = [8, 8], strides = [1, 1]} : vector<8x96xf32> to vector<8x8xf32>
    %cst_119 = arith.constant 0.353553385 : f32
    %270 = vector.broadcast %cst_119 : f32 to vector<8x8xf32>
    %271 = arith.mulf %269, %270 : vector<8x8xf32>
    %272 = vector.extract_strided_slice %223 {offsets = [0, 48], sizes = [8, 8], strides = [1, 1]} : vector<8x96xf32> to vector<8x8xf32>
    %273 = vector.extract_strided_slice %223 {offsets = [0, 80], sizes = [8, 8], strides = [1, 1]} : vector<8x96xf32> to vector<8x8xf32>
    %cst_120 = arith.constant dense<0.000000e+00> : vector<8x8xf32>
    %274 = tpu.matmul %271, %272, %cst_120 {dimension_numbers = #tpu.dot_dimension_numbers<[1], [1], [0], [0], [0, 0, 1, 0], [], []>} : vector<8x8xf32>, vector<8x8xf32>, vector<8x8xf32> -> vector<8x8xf32>
    %275 = arith.addf %274, %11 : vector<8x8xf32>
    %cst_121 = arith.constant dense<0xFF800000> : vector<8xf32>
    %276 = vector.multi_reduction <maximumf>, %275, %cst_121 [1] : vector<8x8xf32> to vector<8xf32>
    %277 = vector.shape_cast %276 : vector<8xf32> to vector<8x1xf32>
    %278 = vector.broadcast %277 : vector<8x1xf32> to vector<8x8xf32>
    %279 = arith.subf %275, %278 : vector<8x8xf32>
    %280 = math.exp %279 : vector<8x8xf32>
    %cst_122 = arith.constant dense<0.000000e+00> : vector<8xf32>
    %281 = vector.multi_reduction <add>, %280, %cst_122 [1] : vector<8x8xf32> to vector<8xf32>
    %282 = vector.shape_cast %281 : vector<8xf32> to vector<8x1xf32>
    %283 = tpu.reciprocal %282 {approx = true} : vector<8x1xf32> -> vector<8x1xf32>
    %284 = vector.broadcast %283 : vector<8x1xf32> to vector<8x8xf32>
    %285 = arith.mulf %280, %284 : vector<8x8xf32>
    %cst_123 = arith.constant dense<0.000000e+00> : vector<8x8xf32>
    %286 = tpu.matmul %285, %273, %cst_123 {dimension_numbers = #tpu.dot_dimension_numbers<[1], [0], [0], [1], [0, 0, 1, 1], [], []>} : vector<8x8xf32>, vector<8x8xf32>, vector<8x8xf32> -> vector<8x8xf32>
    %287 = vector.extract_strided_slice %225 {offsets = [16, 0], sizes = [8, 32], strides = [1, 1]} : vector<32x32xf32> to vector<8x32xf32>
    %cst_124 = arith.constant dense<0.000000e+00> : vector<8x32xf32>
    %288 = tpu.matmul %286, %287, %cst_124 {dimension_numbers = #tpu.dot_dimension_numbers<[1], [0], [0], [1], [0, 0, 1, 1], [], []>} : vector<8x8xf32>, vector<8x32xf32>, vector<8x32xf32> -> vector<8x32xf32>
    %289 = arith.addf %268, %288 : vector<8x32xf32>
    %290 = vector.extract_strided_slice %223 {offsets = [0, 24], sizes = [8, 8], strides = [1, 1]} : vector<8x96xf32> to vector<8x8xf32>
    %cst_125 = arith.constant 0.353553385 : f32
    %291 = vector.broadcast %cst_125 : f32 to vector<8x8xf32>
    %292 = arith.mulf %290, %291 : vector<8x8xf32>
    %293 = vector.extract_strided_slice %223 {offsets = [0, 56], sizes = [8, 8], strides = [1, 1]} : vector<8x96xf32> to vector<8x8xf32>
    %294 = vector.extract_strided_slice %223 {offsets = [0, 88], sizes = [8, 8], strides = [1, 1]} : vector<8x96xf32> to vector<8x8xf32>
    %cst_126 = arith.constant dense<0.000000e+00> : vector<8x8xf32>
    %295 = tpu.matmul %292, %293, %cst_126 {dimension_numbers = #tpu.dot_dimension_numbers<[1], [1], [0], [0], [0, 0, 1, 0], [], []>} : vector<8x8xf32>, vector<8x8xf32>, vector<8x8xf32> -> vector<8x8xf32>
    %296 = arith.addf %295, %11 : vector<8x8xf32>
    %cst_127 = arith.constant dense<0xFF800000> : vector<8xf32>
    %297 = vector.multi_reduction <maximumf>, %296, %cst_127 [1] : vector<8x8xf32> to vector<8xf32>
    %298 = vector.shape_cast %297 : vector<8xf32> to vector<8x1xf32>
    %299 = vector.broadcast %298 : vector<8x1xf32> to vector<8x8xf32>
    %300 = arith.subf %296, %299 : vector<8x8xf32>
    %301 = math.exp %300 : vector<8x8xf32>
    %cst_128 = arith.constant dense<0.000000e+00> : vector<8xf32>
    %302 = vector.multi_reduction <add>, %301, %cst_128 [1] : vector<8x8xf32> to vector<8xf32>
    %303 = vector.shape_cast %302 : vector<8xf32> to vector<8x1xf32>
    %304 = tpu.reciprocal %303 {approx = true} : vector<8x1xf32> -> vector<8x1xf32>
    %305 = vector.broadcast %304 : vector<8x1xf32> to vector<8x8xf32>
    %306 = arith.mulf %301, %305 : vector<8x8xf32>
    %cst_129 = arith.constant dense<0.000000e+00> : vector<8x8xf32>
    %307 = tpu.matmul %306, %294, %cst_129 {dimension_numbers = #tpu.dot_dimension_numbers<[1], [0], [0], [1], [0, 0, 1, 1], [], []>} : vector<8x8xf32>, vector<8x8xf32>, vector<8x8xf32> -> vector<8x8xf32>
    %308 = vector.extract_strided_slice %225 {offsets = [24, 0], sizes = [8, 32], strides = [1, 1]} : vector<32x32xf32> to vector<8x32xf32>
    %cst_130 = arith.constant dense<0.000000e+00> : vector<8x32xf32>
    %309 = tpu.matmul %307, %308, %cst_130 {dimension_numbers = #tpu.dot_dimension_numbers<[1], [0], [0], [1], [0, 0, 1, 1], [], []>} : vector<8x8xf32>, vector<8x32xf32>, vector<8x32xf32> -> vector<8x32xf32>
    %310 = arith.addf %289, %309 : vector<8x32xf32>
    %311 = arith.addf %190, %310 : vector<8x32xf32>
    %c1_131 = arith.constant 1 : index
    %c0_132 = arith.constant 0 : index
    %c0_133 = arith.constant 0 : index
    %312 = vector.load %arg9[%c1_131, %c0_132, %c0_133] : memref<2x1x32xf32, #tpu.memory_space<vmem>>, vector<1x1x32xf32>
    %313 = vector.shape_cast %312 : vector<1x1x32xf32> to vector<1x32xf32>
    %314 = vector.broadcast %313 : vector<1x32xf32> to vector<8x32xf32>
    %315 = arith.addf %311, %314 : vector<8x32xf32>
    %c1_134 = arith.constant 1 : index
    %c0_135 = arith.constant 0 : index
    %c0_136 = arith.constant 0 : index
    %316 = vector.load %arg10[%c1_134, %c0_135, %c0_136] : memref<2x1x32xf32, #tpu.memory_space<vmem>>, vector<1x1x32xf32>
    %317 = vector.shape_cast %316 : vector<1x1x32xf32> to vector<1x32xf32>
    %c1_137 = arith.constant 1 : index
    %c0_138 = arith.constant 0 : index
    %c0_139 = arith.constant 0 : index
    %318 = vector.load %arg11[%c1_137, %c0_138, %c0_139] : memref<2x1x32xf32, #tpu.memory_space<vmem>>, vector<1x1x32xf32>
    %319 = vector.shape_cast %318 : vector<1x1x32xf32> to vector<1x32xf32>
    %cst_140 = arith.constant dense<0.000000e+00> : vector<8xf32>
    %320 = vector.multi_reduction <add>, %315, %cst_140 [1] : vector<8x32xf32> to vector<8xf32>
    %321 = vector.shape_cast %320 : vector<8xf32> to vector<8x1xf32>
    %cst_141 = arith.constant 3.200000e+01 : f32
    %322 = vector.broadcast %cst_141 : f32 to vector<8x1xf32>
    %323 = arith.divf %321, %322 : vector<8x1xf32>
    %324 = vector.broadcast %323 : vector<8x1xf32> to vector<8x32xf32>
    %325 = arith.subf %315, %324 : vector<8x32xf32>
    %326 = arith.mulf %325, %325 : vector<8x32xf32>
    %cst_142 = arith.constant dense<0.000000e+00> : vector<8xf32>
    %327 = vector.multi_reduction <add>, %326, %cst_142 [1] : vector<8x32xf32> to vector<8xf32>
    %328 = vector.shape_cast %327 : vector<8xf32> to vector<8x1xf32>
    %cst_143 = arith.constant 3.200000e+01 : f32
    %329 = vector.broadcast %cst_143 : f32 to vector<8x1xf32>
    %330 = arith.divf %328, %329 : vector<8x1xf32>
    %331 = vector.broadcast %323 : vector<8x1xf32> to vector<8x32xf32>
    %332 = arith.subf %315, %331 : vector<8x32xf32>
    %cst_144 = arith.constant 9.99999996E-13 : f32
    %333 = vector.broadcast %cst_144 : f32 to vector<8x1xf32>
    %334 = arith.addf %330, %333 : vector<8x1xf32>
    %335 = math.rsqrt %334 : vector<8x1xf32>
    %336 = vector.broadcast %335 : vector<8x1xf32> to vector<8x32xf32>
    %337 = arith.mulf %332, %336 : vector<8x32xf32>
    %338 = vector.broadcast %317 : vector<1x32xf32> to vector<8x32xf32>
    %339 = arith.mulf %337, %338 : vector<8x32xf32>
    %340 = vector.broadcast %319 : vector<1x32xf32> to vector<8x32xf32>
    %341 = arith.addf %339, %340 : vector<8x32xf32>
    %c1_145 = arith.constant 1 : index
    %c0_146 = arith.constant 0 : index
    %c0_147 = arith.constant 0 : index
    %342 = vector.load %arg12[%c1_145, %c0_146, %c0_147] : memref<2x32x64xf32, #tpu.memory_space<vmem>>, vector<1x32x64xf32>
    %343 = vector.shape_cast %342 : vector<1x32x64xf32> to vector<32x64xf32>
    %cst_148 = arith.constant dense<0.000000e+00> : vector<8x64xf32>
    %344 = tpu.matmul %341, %343, %cst_148 {dimension_numbers = #tpu.dot_dimension_numbers<[1], [0], [0], [1], [0, 0, 1, 1], [], []>} : vector<8x32xf32>, vector<32x64xf32>, vector<8x64xf32> -> vector<8x64xf32>
    %c1_149 = arith.constant 1 : index
    %c0_150 = arith.constant 0 : index
    %c0_151 = arith.constant 0 : index
    %345 = vector.load %arg13[%c1_149, %c0_150, %c0_151] : memref<2x1x64xf32, #tpu.memory_space<vmem>>, vector<1x1x64xf32>
    %346 = vector.shape_cast %345 : vector<1x1x64xf32> to vector<1x64xf32>
    %347 = vector.broadcast %346 : vector<1x64xf32> to vector<8x64xf32>
    %348 = arith.addf %344, %347 : vector<8x64xf32>
    %349 = arith.mulf %348, %348 : vector<8x64xf32>
    %350 = arith.mulf %348, %349 : vector<8x64xf32>
    %cst_152 = arith.constant 4.471500e-02 : f32
    %351 = vector.broadcast %cst_152 : f32 to vector<8x64xf32>
    %352 = arith.mulf %351, %350 : vector<8x64xf32>
    %353 = arith.addf %348, %352 : vector<8x64xf32>
    %cst_153 = arith.constant 0.797884583 : f32
    %354 = vector.broadcast %cst_153 : f32 to vector<8x64xf32>
    %355 = arith.mulf %354, %353 : vector<8x64xf32>
    %356 = math.tanh %355 : vector<8x64xf32>
    %cst_154 = arith.constant 1.000000e+00 : f32
    %357 = vector.broadcast %cst_154 : f32 to vector<8x64xf32>
    %358 = arith.addf %357, %356 : vector<8x64xf32>
    %cst_155 = arith.constant 5.000000e-01 : f32
    %359 = vector.broadcast %cst_155 : f32 to vector<8x64xf32>
    %360 = arith.mulf %359, %358 : vector<8x64xf32>
    %361 = arith.mulf %348, %360 : vector<8x64xf32>
    %c1_156 = arith.constant 1 : index
    %c0_157 = arith.constant 0 : index
    %c0_158 = arith.constant 0 : index
    %362 = vector.load %arg14[%c1_156, %c0_157, %c0_158] : memref<2x64x32xf32, #tpu.memory_space<vmem>>, vector<1x64x32xf32>
    %363 = vector.shape_cast %362 : vector<1x64x32xf32> to vector<64x32xf32>
    %cst_159 = arith.constant dense<0.000000e+00> : vector<8x32xf32>
    %364 = tpu.matmul %361, %363, %cst_159 {dimension_numbers = #tpu.dot_dimension_numbers<[1], [0], [0], [1], [0, 0, 1, 1], [], []>} : vector<8x64xf32>, vector<64x32xf32>, vector<8x32xf32> -> vector<8x32xf32>
    %365 = arith.addf %315, %364 : vector<8x32xf32>
    %c1_160 = arith.constant 1 : index
    %c0_161 = arith.constant 0 : index
    %c0_162 = arith.constant 0 : index
    %366 = vector.load %arg15[%c1_160, %c0_161, %c0_162] : memref<2x1x32xf32, #tpu.memory_space<vmem>>, vector<1x1x32xf32>
    %367 = vector.shape_cast %366 : vector<1x1x32xf32> to vector<1x32xf32>
    %368 = vector.broadcast %367 : vector<1x32xf32> to vector<8x32xf32>
    %369 = arith.addf %365, %368 : vector<8x32xf32>
    %370 = vector.extract_strided_slice %369 {offsets = [0, 0], sizes = [1, 32], strides = [1, 1]} : vector<8x32xf32> to vector<1x32xf32>
    %c0_163 = arith.constant 0 : index
    %c0_164 = arith.constant 0 : index
    %371 = vector.load %arg16[%c0_163, %c0_164] : memref<1x32xf32, #tpu.memory_space<vmem>>, vector<1x32xf32>
    %c0_165 = arith.constant 0 : index
    %c0_166 = arith.constant 0 : index
    %372 = vector.load %arg17[%c0_165, %c0_166] : memref<1x32xf32, #tpu.memory_space<vmem>>, vector<1x32xf32>
    %cst_167 = arith.constant dense<0.000000e+00> : vector<1xf32>
    %373 = vector.multi_reduction <add>, %370, %cst_167 [1] : vector<1x32xf32> to vector<1xf32>
    %374 = vector.shape_cast %373 : vector<1xf32> to vector<1x1xf32>
    %cst_168 = arith.constant 3.200000e+01 : f32
    %375 = vector.broadcast %cst_168 : f32 to vector<1x1xf32>
    %376 = arith.divf %374, %375 : vector<1x1xf32>
    %377 = vector.broadcast %376 : vector<1x1xf32> to vector<1x32xf32>
    %378 = arith.subf %370, %377 : vector<1x32xf32>
    %379 = arith.mulf %378, %378 : vector<1x32xf32>
    %cst_169 = arith.constant dense<0.000000e+00> : vector<1xf32>
    %380 = vector.multi_reduction <add>, %379, %cst_169 [1] : vector<1x32xf32> to vector<1xf32>
    %381 = vector.shape_cast %380 : vector<1xf32> to vector<1x1xf32>
    %cst_170 = arith.constant 3.200000e+01 : f32
    %382 = vector.broadcast %cst_170 : f32 to vector<1x1xf32>
    %383 = arith.divf %381, %382 : vector<1x1xf32>
    %384 = vector.broadcast %376 : vector<1x1xf32> to vector<1x32xf32>
    %385 = arith.subf %370, %384 : vector<1x32xf32>
    %cst_171 = arith.constant 9.99999996E-13 : f32
    %386 = vector.broadcast %cst_171 : f32 to vector<1x1xf32>
    %387 = arith.addf %383, %386 : vector<1x1xf32>
    %388 = math.rsqrt %387 : vector<1x1xf32>
    %389 = vector.broadcast %388 : vector<1x1xf32> to vector<1x32xf32>
    %390 = arith.mulf %385, %389 : vector<1x32xf32>
    %391 = arith.mulf %390, %371 : vector<1x32xf32>
    %392 = arith.addf %391, %372 : vector<1x32xf32>
    %c0_172 = arith.constant 0 : index
    %c0_173 = arith.constant 0 : index
    %393 = vector.load %arg18[%c0_172, %c0_173] : memref<32x8xf32, #tpu.memory_space<vmem>>, vector<32x8xf32>
    %cst_174 = arith.constant dense<0.000000e+00> : vector<1x8xf32>
    %394 = tpu.matmul %392, %393, %cst_174 {dimension_numbers = #tpu.dot_dimension_numbers<[1], [0], [0], [1], [0, 0, 1, 1], [], []>} : vector<1x32xf32>, vector<32x8xf32>, vector<1x8xf32> -> vector<1x8xf32>
    %c0_175 = arith.constant 0 : index
    %c0_176 = arith.constant 0 : index
    %395 = vector.load %arg19[%c0_175, %c0_176] : memref<1x8xf32, #tpu.memory_space<vmem>>, vector<1x8xf32>
    %396 = arith.addf %394, %395 : vector<1x8xf32>
    %c0_177 = arith.constant 0 : index
    %c0_178 = arith.constant 0 : index
    %c0_179 = arith.constant 0 : index
    %397 = vector.load %arg20[%c0_177, %c0_178, %c0_179] : memref<1x1x8xf32, #tpu.memory_space<vmem>>, vector<1x1x8xf32>
    %398 = vector.shape_cast %397 : vector<1x1x8xf32> to vector<1x8xf32>
    %399 = vector.shape_cast %396 : vector<1x8xf32> to vector<1x1x8xf32>
    tpu.vector_store %arg20[%c0_177, %c0_178, %c0_179], %399 {strides = array<i32>} : memref<1x1x8xf32, #tpu.memory_space<vmem>>, vector<1x1x8xf32>,
    return
  }
  func.func @transform_0(%arg0: i32) -> (i32, i32, i32) {
    %c0_i32 = arith.constant 0 : i32
    %c0_i32_0 = arith.constant 0 : i32
    %c0_i32_1 = arith.constant 0 : i32
    return %arg0, %c0_i32, %c0_i32_0 : i32, i32, i32
  }
  func.func @transform_1(%arg0: i32) -> (i32, i32) {
    %c0_i32 = arith.constant 0 : i32
    %c0_i32_0 = arith.constant 0 : i32
    %c0_i32_1 = arith.constant 0 : i32
    return %c0_i32, %c0_i32_0 : i32, i32
  }
  func.func @transform_2(%arg0: i32) -> (i32, i32) {
    %c0_i32 = arith.constant 0 : i32
    %c0_i32_0 = arith.constant 0 : i32
    %c0_i32_1 = arith.constant 0 : i32
    return %c0_i32, %c0_i32_0 : i32, i32
  }
  func.func @transform_3(%arg0: i32) -> (i32, i32, i32) {
    %c0_i32 = arith.constant 0 : i32
    %c0_i32_0 = arith.constant 0 : i32
    %c0_i32_1 = arith.constant 0 : i32
    %c0_i32_2 = arith.constant 0 : i32
    return %c0_i32, %c0_i32_0, %c0_i32_1 : i32, i32, i32
  }
  func.func @transform_4(%arg0: i32) -> (i32, i32, i32) {
    %c0_i32 = arith.constant 0 : i32
    %c0_i32_0 = arith.constant 0 : i32
    %c0_i32_1 = arith.constant 0 : i32
    %c0_i32_2 = arith.constant 0 : i32
    return %c0_i32, %c0_i32_0, %c0_i32_1 : i32, i32, i32
  }
  func.func @transform_5(%arg0: i32) -> (i32, i32, i32) {
    %c0_i32 = arith.constant 0 : i32
    %c0_i32_0 = arith.constant 0 : i32
    %c0_i32_1 = arith.constant 0 : i32
    %c0_i32_2 = arith.constant 0 : i32
    return %c0_i32, %c0_i32_0, %c0_i32_1 : i32, i32, i32
  }
  func.func @transform_6(%arg0: i32) -> (i32, i32, i32) {
    %c0_i32 = arith.constant 0 : i32
    %c0_i32_0 = arith.constant 0 : i32
    %c0_i32_1 = arith.constant 0 : i32
    %c0_i32_2 = arith.constant 0 : i32
    return %c0_i32, %c0_i32_0, %c0_i32_1 : i32, i32, i32
  }
  func.func @transform_7(%arg0: i32) -> (i32, i32, i32) {
    %c0_i32 = arith.constant 0 : i32
    %c0_i32_0 = arith.constant 0 : i32
    %c0_i32_1 = arith.constant 0 : i32
    %c0_i32_2 = arith.constant 0 : i32
    return %c0_i32, %c0_i32_0, %c0_i32_1 : i32, i32, i32
  }
  func.func @transform_8(%arg0: i32) -> (i32, i32, i32) {
    %c0_i32 = arith.constant 0 : i32
    %c0_i32_0 = arith.constant 0 : i32
    %c0_i32_1 = arith.constant 0 : i32
    %c0_i32_2 = arith.constant 0 : i32
    return %c0_i32, %c0_i32_0, %c0_i32_1 : i32, i32, i32
  }
  func.func @transform_9(%arg0: i32) -> (i32, i32, i32) {
    %c0_i32 = arith.constant 0 : i32
    %c0_i32_0 = arith.constant 0 : i32
    %c0_i32_1 = arith.constant 0 : i32
    %c0_i32_2 = arith.constant 0 : i32
    return %c0_i32, %c0_i32_0, %c0_i32_1 : i32, i32, i32
  }
  func.func @transform_10(%arg0: i32) -> (i32, i32, i32) {
    %c0_i32 = arith.constant 0 : i32
    %c0_i32_0 = arith.constant 0 : i32
    %c0_i32_1 = arith.constant 0 : i32
    %c0_i32_2 = arith.constant 0 : i32
    return %c0_i32, %c0_i32_0, %c0_i32_1 : i32, i32, i32
  }
  func.func @transform_11(%arg0: i32) -> (i32, i32, i32) {
    %c0_i32 = arith.constant 0 : i32
    %c0_i32_0 = arith.constant 0 : i32
    %c0_i32_1 = arith.constant 0 : i32
    %c0_i32_2 = arith.constant 0 : i32
    return %c0_i32, %c0_i32_0, %c0_i32_1 : i32, i32, i32
  }
  func.func @transform_12(%arg0: i32) -> (i32, i32, i32) {
    %c0_i32 = arith.constant 0 : i32
    %c0_i32_0 = arith.constant 0 : i32
    %c0_i32_1 = arith.constant 0 : i32
    %c0_i32_2 = arith.constant 0 : i32
    return %c0_i32, %c0_i32_0, %c0_i32_1 : i32, i32, i32
  }
  func.func @transform_13(%arg0: i32) -> (i32, i32, i32) {
    %c0_i32 = arith.constant 0 : i32
    %c0_i32_0 = arith.constant 0 : i32
    %c0_i32_1 = arith.constant 0 : i32
    %c0_i32_2 = arith.constant 0 : i32
    return %c0_i32, %c0_i32_0, %c0_i32_1 : i32, i32, i32
  }
  func.func @transform_14(%arg0: i32) -> (i32, i32, i32) {
    %c0_i32 = arith.constant 0 : i32
    %c0_i32_0 = arith.constant 0 : i32
    %c0_i32_1 = arith.constant 0 : i32
    %c0_i32_2 = arith.constant 0 : i32
    return %c0_i32, %c0_i32_0, %c0_i32_1 : i32, i32, i32
  }
  func.func @transform_15(%arg0: i32) -> (i32, i32) {
    %c0_i32 = arith.constant 0 : i32
    %c0_i32_0 = arith.constant 0 : i32
    %c0_i32_1 = arith.constant 0 : i32
    return %c0_i32, %c0_i32_0 : i32, i32
  }
  func.func @transform_16(%arg0: i32) -> (i32, i32) {
    %c0_i32 = arith.constant 0 : i32
    %c0_i32_0 = arith.constant 0 : i32
    %c0_i32_1 = arith.constant 0 : i32
    return %c0_i32, %c0_i32_0 : i32, i32
  }
  func.func @transform_17(%arg0: i32) -> (i32, i32) {
    %c0_i32 = arith.constant 0 : i32
    %c0_i32_0 = arith.constant 0 : i32
    %c0_i32_1 = arith.constant 0 : i32
    return %c0_i32, %c0_i32_0 : i32, i32
  }
  func.func @transform_18(%arg0: i32) -> (i32, i32) {
    %c0_i32 = arith.constant 0 : i32
    %c0_i32_0 = arith.constant 0 : i32
    %c0_i32_1 = arith.constant 0 : i32
    return %c0_i32, %c0_i32_0 : i32, i32
  }
  func.func @transform_19(%arg0: i32) -> (i32, i32, i32) {
    %c0_i32 = arith.constant 0 : i32
    %c0_i32_0 = arith.constant 0 : i32
    %c0_i32_1 = arith.constant 0 : i32
    return %arg0, %c0_i32, %c0_i32_0 : i32, i32, i32
  }
}

</mosaic_0001>

<bundles_post_ra>
// kernel: vit_forward.1
= control target key start
LH: loop header
LB: loop body
LE: loop exit
PB: predicated region body
PF: predicated region fallthrough
CT: control target
= control target key end

     0   :  { %s4884_s0 = inlined_call_operand.vmem [shape: f32[2,8,194], index: 0, kind: input, shape index: {}]   ;;  %s4885_s1 = inlined_call_operand.vmem [shape: f32[8,32], index: 1, kind: input, shape index: {}]   ;;  %s4886_s2 = inlined_call_operand.vmem [shape: f32[194,32], index: 2, kind: input, shape index: {}]   ;;  %s4887_s3 = inlined_call_operand.vmem [shape: f32[2,1,32], index: 3, kind: input, shape index: {}]   ;;  %s4888_s4 = inlined_call_operand.vmem [shape: f32[2,1,32], index: 4, kind: input, shape index: {}]   ;;  %s4889_s5 = inlined_call_operand.vmem [shape: f32[2,32,96], index: 5, kind: input, shape index: {}]   ;;  %s4890_s6 = inlined_call_operand.vmem [shape: f32[2,1,96], index: 6, kind: input, shape index: {}]   ;;  %s4891_s7 = inlined_call_operand.vmem [shape: f32[2,32,32], index: 7, kind: input, shape index: {}]   ;;  %s4892_s8 = inlined_call_operand.vmem [shape: f32[2,1,32], index: 8, kind: input, shape index: {}]   ;;  %s4893_s9 = inlined_call_operand.vmem [shape: f32[2,1,32], index: 9, kind: input, shape index: {}]   ;;  %s4894_s10 = inlined_call_operand.vmem [shape: f32[2,1,32], index: 10, kind: input, shape index: {}]   ;;  %s4895_s11 = inlined_call_operand.vmem [shape: f32[2,32,64], index: 11, kind: input, shape index: {}]   ;;  %s4896_s12 = inlined_call_operand.vmem [shape: f32[2,1,64], index: 12, kind: input, shape index: {}]   ;;  %s4897_s13 = inlined_call_operand.vmem [shape: f32[2,64,32], index: 13, kind: input, shape index: {}]   ;;  %s4898_s14 = inlined_call_operand.vmem [shape: f32[2,1,32], index: 14, kind: input, shape index: {}]   ;;  %s4899_s15 = inlined_call_operand.vmem [shape: f32[1,32], index: 15, kind: input, shape index: {}]   ;;  %s4900_s16 = inlined_call_operand.vmem [shape: f32[1,32], index: 16, kind: input, shape index: {}]   ;;  %s4901_s17 = inlined_call_operand.vmem [shape: f32[32,8], index: 17, kind: input, shape index: {}]   ;;  %s4902_s18 = inlined_call_operand.vmem [shape: f32[1,8], index: 18, kind: input, shape index: {}]   ;;  %s4903_s19 = inlined_call_operand.hbm [shape: f32[2,1,8], index: 19, kind: output, shape index: {}]  }
   0x1   :  { %4921 = sst [smem:[#allocation11_spill]] %s4884_s0 }
   0x2   :  { %4922 = sst [smem:[#allocation12_spill]] %s4885_s1 }
   0x3   :  { %4923 = sst [smem:[#allocation13_spill]] %s4886_s2 }
   0x4   :  { %4924 = sst [smem:[#allocation14_spill]] %s4887_s3 }
   0x5   :  { %4925 = sst [smem:[#allocation15_spill]] %s4888_s4 }
   0x6   :  { %4926 = sst [smem:[#allocation16_spill]] %s4889_s5 }
   0x7   :  { %4927 = sst [smem:[#allocation17_spill]] %s4903_s19 }
   0x8   :  { %24 = vsyncpa [#allocation3], 0 }
   0x9   :  { %26 = vsyncpa [#allocation3 + $0x1], 0  ;;  %s4247_s0 = smov 0   ;;  %s4249_s30 = smov 0  }
   0xa   :  { %s4251_s20 = smov 0   ;;  %s4253_s21 = smov 0  }
   0xb LB: > { %4928 = sst [smem:[#allocation5_spill]] %s4117_s0  ;;  %s4268_s1 = sadd.s32 4294967295, %s4129_s21   ;;  %s4129_s21 = sphi %s4253_s21, %s4955_s21   ;;  %s4125_s20 = sphi %s4251_s20, %s4957_s20   ;;  %s4121_s30 = sphi %s4249_s30, %s4959_s30   ;;  %s4117_s0 = sphi %s4247_s0, %s4958_s0  }
   0xc   : > { %4929 = sst [smem:[#allocation6_spill]] %s4125_s20  ;;  %s3478_s22 = sadd.s32 4294967294, %s4129_s21  }
   0xd   : > { %4930 = sst [smem:[#allocation7_spill]] %s4129_s21  ;;  %s4272_s2 = sadd.s32 1, %s4129_s21  }
   0xe   : > { %4931 = sst [smem:[#allocation8_spill]] %s4272_s2  ;;  %s443_s23 = sadd.s32 1, %s4125_s20 }
   0xf   : > { %s440_s24 = ssub.s32 %s4129_s21, %s4272_s2  ;;  %p453_p0 = scmp.ne.s32.totalorder %s4125_s20, %s4121_s30 }
  0x10   : > { %p441_p1 = scmp.eq.s32.totalorder %s440_s24, 0  ;;  %p454_p2 = scmp.eq.s32.totalorder %s4268_s1, 1 }
  0x11   : > { %p459_p3 = scmp.ne.s32.totalorder %s4121_s30, %s4117_s0  ;;  %p460_p4 = scmp.eq.s32.totalorder %s3478_s22, 1 }
  0x12   : > { %s4283_s25 = scalar_select %p441_p1, %s4125_s20, %s443_s23  }
  0x13   : > { %p4285_p5 = por %p454_p2, %p453_p0  ;;  %p4289_p6 = por %p460_p4, %p459_p3 }
  0x14   : > { %4932 = sst [smem:[#allocation9_spill]] %s4283_s25  ;;  %p3481_p7 = scmp.ge.s32.totalorder %s4129_s21, 1 }
  0x15   : > { %s4934_s26 = scalar_select %p4289_p6, 1, 0 }
  0x16   : > { %p540_p8 = scmp.lt.s32.totalorder %s4129_s21, 3 }
  0x17   : > { %4935 = sst [smem:[#allocation10_spill]] %s4934_s26 }
  0x18   : > { %p541_p9 = pnand %p3481_p7, %p540_p8 }
  0x19   : > { %s4936_s29 = sld [smem:[#allocation13_spill]] (!%p541_p9)  ;;  %v4131_v3 = vmov (!%p541_p9), 0.0|0.0   ;;  %p595_p10 = scmp.lt.s32.totalorder (!%p541_p9), %s4268_s1, 1  ;;  %vm628_vm0 = vcmask (!%p541_p9), 539648   ;;  %v4132_v38 = vmov (!%p541_p9), 0.0   ;;  %vm632_vm1 = vcmask (!%p541_p9), 1041408  }
  0x1a   : > { %544 = sbr.rel (%p541_p9) target bundleno = 8891 (0x22bb), region = 96  ;;  %3877 = vmatprep.subr.bf16.mxu0 (!%p541_p9), %v4131_v3  ;;  %3913 = vmatprep.subr.bf16.mxu1 (!%p541_p9), %v4131_v3  ;;  %s4937_s2 = sld [smem:[#allocation11_spill]] (!%p541_p9)  ;;  %vm712_vm2 = vcmask (!%p541_p9), 261120   ;;  %vm4133_vm3 = vmmov (!%p541_p9), 0   ;;  %vm833_vm4 = vcmask (!%p541_p9), 64512   ;;  %vm1924_vm6 = vcmask (!%p541_p9), 523264  }
  0x1b   : > { %s4938_s23 = sld [smem:[#allocation12_spill]] (!%p541_p9)  ;;  %s4939_s5 = sld [smem:[#allocation16_spill]] (!%p541_p9)  ;;  %3672 = vmatprep.mubr.msk.f32.mxu1 (!%p541_p9), %vm4133_vm3, %v4132_v38  ;;  %vm3314_vm7 = vcmask (!%p541_p9), 253952   ;;  %vm3408_vm8 = vcmask (!%p541_p9), 57344  }
  0x1c   : > { %s4940_s25 = sld [smem:[#allocation14_spill]] (!%p541_p9)  ;;  %s4941_s4 = sld [smem:[#allocation15_spill]] (!%p541_p9) }
  0x1d   : > { %s4135_s20 = smov (!%p541_p9), 96   ;;  %s4138_s28 = smov (!%p541_p9), 120  }
  0x1e   : > { %s4920_s22 = smov (!%p541_p9), 56   ;;  %s4919_s26 = smov (!%p541_p9), 80  }
  0x1f   : > { %v602_v0 = vld [vmem:[%s4936_s29] sm:$0xff] (!%p541_p9)  ;;  %v603_v1 = vld [vmem:[%s4936_s29 + $0x8] sm:$0xff] (!%p541_p9)  ;;  %v604_v2 = vld [vmem:[%s4936_s29 + $0x10] sm:$0xff] (!%p541_p9)  ;;  %s4916_s19 = smov (!%p541_p9), 104   ;;  %s4950_s21 = sld [smem:[#allocation17_spill]] (!%p541_p9) }
  0x20   : > { %v3878_v4 = vpack.c.bf16 (!%p541_p9), %v603_v1, %v602_v0  ;;  %v605_v5 = vld [vmem:[%s4936_s29 + $0x18] sm:$0xff] (!%p541_p9)  ;;  %v606_v7 = vld [vmem:[%s4936_s29 + $0x20] sm:$0xff] (!%p541_p9)  ;;  %v607_v8 = vld [vmem:[%s4936_s29 + $0x28] sm:$0xff] (!%p541_p9) }
  0x21   : > { %v3881_v6 = vpack.c.bf16 %v605_v5, %v604_v2  ;;  %s596_s27 = scalar_select %p595_p10, %s4268_s1, 1  ;;  %v3884_v9 = vpack.c.bf16 %v607_v8, %v606_v7  ;;  %v608_v10 = vld [vmem:[%s4936_s29 + $0x30] sm:$0xff]  ;;  %v609_v11 = vld [vmem:[%s4936_s29 + $0x38] sm:$0xff]  ;;  %v610_v14 = vld [vmem:[%s4936_s29 + $0x40] sm:$0xff] }
  0x22   : > { %3879 = vmatpush1.bf16.msra.mxu0 %v3878_v4  ;;  %v3887_v13 = vpack.c.bf16 %v609_v11, %v608_v10  ;;  %v611_v15 = vld [vmem:[%s4936_s29 + $0x48] sm:$0xff]  ;;  %v612_v17 = vld [vmem:[%s4936_s29 + $0x50] sm:$0xff]  ;;  %v613_v18 = vld [vmem:[%s4936_s29 + $0x58] sm:$0xff]  ;;  %v706_v10 = vlaneseq }
  0x23   : > { %3880 = vmatprep.subr.bf16.mxu0 %v4131_v3  ;;  %s3572_s24 = sshll.u32 %s596_s27, 4  ;;  %v3890_v16 = vpack.c.bf16 %v611_v15, %v610_v14  ;;  %v3893_v19 = vpack.c.bf16 %v613_v18, %v612_v17  ;;  %v614_v20 = vld [vmem:[%s4936_s29 + $0x60] sm:$0xff]  ;;  %v615_v21 = vld [vmem:[%s4936_s29 + $0x68] sm:$0xff]  ;;  %v616_v23 = vld [vmem:[%s4936_s29 + $0x70] sm:$0xff]  ;;  %s4918_s27 = smov 112  }
  0x24   : > { %s4321_s0 = scalar_lea.vmem %s4937_s2, %s3572_s24  ;;  %v3896_v22 = vpack.c.bf16 %v615_v21, %v614_v20  ;;  %v617_v24 = vld [vmem:[%s4936_s29 + $0x78] sm:$0xff]  ;;  %v618_v26 = vld [vmem:[%s4936_s29 + $0x80] sm:$0xff]  ;;  %v619_v27 = vld [vmem:[%s4936_s29 + $0x88] sm:$0xff]  ;;  %s4913_s24 = smov 64   ;;  %v707_v11 = vand.u32 127, %v706_v10 }
  0x25   : > { %v601_v12 = vld [vmem:[%s4321_s0 + $0x8] sm:$0xff]  ;;  %v3899_v25 = vpack.c.bf16 %v617_v24, %v616_v23  ;;  %v3902_v28 = vpack.c.bf16 %v619_v27, %v618_v26  ;;  %v620_v29 = vld [vmem:[%s4936_s29 + $0x90] sm:$0xff]  ;;  %v621_v30 = vld [vmem:[%s4936_s29 + $0x98] sm:$0xff]  ;;  %s4136_s2 = smov 88  }
  0x26   : > { %3882 = vmatpush1.bf16.msra.mxu0 %v3881_v6  ;;  %3485 = vmatprep.mubr.msk.f32.mxu0 %vm628_vm0, %v601_v12  ;;  %v3905_v31 = vpack.c.bf16 %v621_v30, %v620_v29  ;;  %v622_v32 = vld [vmem:[%s4936_s29 + $0xa0] sm:$0xff]  ;;  %v623_v33 = vld [vmem:[%s4936_s29 + $0xa8] sm:$0xff]  ;;  %v624_v35 = vld [vmem:[%s4936_s29 + $0xb0] sm:$0xff]  ;;  %vm708_vm5 = vcmp.lt.s32.totalorder %v707_v11, 5  ;;  %v4137_v12 = vmov -1e+30  }
  0x27   : > { %3883 = vmatprep.subr.bf16.mxu0 %v4131_v3  ;;  %v3908_v34 = vpack.c.bf16 %v623_v33, %v622_v32  ;;  %v625_v36 = vld [vmem:[%s4936_s29 + $0xb8] sm:$0xff]  ;;  %v626_v39 = vld [vmem:[%s4936_s29 + $0xc0] sm:$0x3]  ;;  %v742_v52 = vld [vmem:[%s4939_s5 + $0x8] sm:$0xff] }
  0x28   : > { %v3911_v37 = vpack.c.bf16 %v625_v36, %v624_v35  ;;  %v600_v40 = vld [vmem:[%s4321_s0] sm:$0xff]  ;;  %v743_v53 = vld [vmem:[%s4939_s5 + $0x10] sm:$0xff]  ;;  %v744_v55 = vld [vmem:[%s4939_s5 + $0x18] sm:$0xff]  ;;  %s4914_s0 = smov 72  }
  0x29   : > { %v627_v41 = vld [vmem:[%s4938_s23] sm:$0xff]  ;;  %v3917_v56 = vpack.c.bf16 %v744_v55, %v743_v53  ;;  %s4917_s23 = smov 48  }
  0x2a   : > { %3885 = vmatpush1.bf16.msra.mxu0 %v3884_v9  ;;  %v741_v51 = vld [vmem:[%s4939_s5] sm:$0xff] }
  0x2b   : > { %3886 = vmatprep.subr.bf16.mxu0 %v4131_v3  ;;  %v3914_v54 = vpack.c.bf16 %v742_v52, %v741_v51  ;;  %v3486_v61 = vld [vmem:[%s4940_s25] ss:$0 sm:$0xff] }
  0x2c   : > { %v3487_v63 = vld [vmem:[%s4941_s4] ss:$0 sm:$0xff] }
  0x2d   : > { %3915 = vmatpush3.bf16.msra.mxu1 %v3914_v54  ;;  %v3488_v2 = vld [vmem:[%s4890_s6] ss:$0 sm:$0xff] }
  0x2e   : > { %3888 = vmatpush1.bf16.msra.mxu0 %v3887_v13  ;;  %3916 = vmatprep.subr.bf16.mxu1 %v4131_v3  ;;  %v4451_v13 = vsel %vm708_vm5, 0.0, %v4137_v12 }
  0x2f   : > { %3889 = vmatprep.subr.bf16.mxu0 %v4131_v3 }
  0x31   : > { %3918 = vmatpush3.bf16.msra.mxu1 %v3917_v56 }
  0x32   : > { %3891 = vmatpush1.bf16.msra.mxu0 %v3890_v16  ;;  %3675 = vmatprep.subr.mxu1 %v4132_v38 }
  0x33   : > { %3892 = vmatprep.subr.bf16.mxu0 %v4131_v3 }
  0x36   : > { %3894 = vmatpush1.bf16.msra.mxu0 %v3893_v19 }
  0x37   : > { %3895 = vmatprep.subr.bf16.mxu0 %v4131_v3 }
  0x3a   : > { %3897 = vmatpush1.bf16.msra.mxu0 %v3896_v22 }
  0x3b   : > { %3898 = vmatprep.subr.bf16.mxu0 %v4131_v3 }
  0x3e   : > { %3900 = vmatpush1.bf16.msra.mxu0 %v3899_v25 }
  0x3f   : > { %3901 = vmatprep.subr.bf16.mxu0 %v4131_v3 }
  0x42   : > { %3903 = vmatpush1.bf16.msra.mxu0 %v3902_v28 }
  0x43   : > { %3904 = vmatprep.subr.bf16.mxu0 %v4131_v3 }
  0x46   : > { %3906 = vmatpush1.bf16.msra.mxu0 %v3905_v31 }
  0x47   : > { %3907 = vmatprep.subr.bf16.mxu0 %v4131_v3 }
  0x4a   : > { %3909 = vmatpush1.bf16.msra.mxu0 %v3908_v34 }
  0x4b   : > { %3910 = vmatprep.subr.bf16.mxu0 %v4131_v3 }
  0x4e   : > { %3912 = vmatpush1.bf16.msra.mxu0 %v3911_v37 }
  0x4f   : > { %684 = vmatprep.subr.mxu0 %v4132_v38 }
  0x52   : > { %3484 = vmatpush1.msk.msra.mxu0 %vm632_vm1, %v626_v39 }
  0x53   : > { %701 = vmatmul.mubr.f32.vlgmr.msra.gmra.mrb[0].mxu0 %v600_v40  ;;  %3730 = vmatprep.subr.mxu0 %v4132_v38 }
  0x54   : > { %3732 = vmatprep.mubr.msk.f32.mxu0 %vm4133_vm3, %v4132_v38 }
 0x126   : > { %v702_v42 = vpop.f32.mrb[0].mxu0 }
 0x127   : > { %v4397_v43 = vadd.f32 %v702_v42, %v627_v41  ;;  %v704_v44 = vpop.f32.mrb[1].mxu0 }
 0x129   : > { %v713_v45 = vsel %vm712_vm2, %v4397_v43, 0.0 }
 0x12a   : > { %714 = vadd.xlane.f32.xlu0 %v713_v45  ;;  %v826_v45 = vld [vmem:[%s4891_s7 + $0x8] sm:$0xff] }
 0x1b7   : > { %v715_v46 = vpop.xlane.xlu0 %714 }
 0x1b8   : > { %v717_v47 = vmul.f32 0.03125, %v715_v46  ;;  %v825_v46 = vld [vmem:[%s4891_s7] sm:$0xff] }
 0x1ba   : > { %v718_v48 = vsub.f32 %v4397_v43, %v717_v47 }
 0x1bc   : > { %v719_v49 = vmul.f32 %v718_v48, %v718_v48 }
 0x1be   : > { %v720_v50 = vsel %vm712_vm2, %v719_v49, 0.0 }
 0x1bf   : > { %721 = vadd.xlane.f32.xlu0 %v720_v50 }
 0x24c   : > { %v722_v57 = vpop.xlane.xlu0 %721 }
 0x24d   : > { %v723_v58 = vmul.f32 0.03125, %v722_v57 }
 0x24f   : > { %v724_v59 = vadd.f32 1e-12, %v723_v58 }
 0x251   : > { %4021 = vrsqrt.f32 %v724_v59 }
 0x25b   : > { %v4022_v60 = vpop.eup %4021 }
 0x25c   : > { %v726_v62 = vmul.f32 %v4022_v60, %v718_v48 }
 0x25e   : > { %v733_v0 = vmul.f32 %v3486_v61, %v726_v62 }
 0x260   : > { %v740_v1 = vadd.f32 %v3487_v63, %v733_v0 }
 0x262   : > { %3673 = vmatmul.mubr.msk.f32.vlgmr.msra.gmra.mrb[0].mxu1 %vm712_vm2, %v740_v1 }
 0x263   : > { %3677 = vmatprep.mubr.msk.f32.mxu1 %vm4133_vm3, %v4132_v38 }
 0x335   : > { %v821_v4 = vpop.f32.mrb[0].mxu1 }
 0x336   : > { %v4433_v5 = vadd.f32 %v3488_v2, %v821_v4  ;;  %v3674_v6 = vpop.f32.mrb[1].mxu1 }
 0x338   : > { %920 = vrot.lane.b32.xlu0 %v4433_v5, %s4913_s24  ;;  %831 = vrot.lane.b32.xlu1 %v4433_v5, %s4135_s20  ;;  %v4443_v8 = vmul.f32 0.35355338, %v4433_v5  ;;  %s4915_s24 = smov 40  }
 0x33c   : > { %998 = vrot.lane.b32.xlu0 %v4433_v5, %s4136_s2 }
 0x3aa   : > { %v832_v7 = vpop.permute.xlu1 %831  ;;  %v921_v9 = vpop.permute.xlu0 %920 }
 0x3ab   : > { %3676 = vmatpush3.xpose.msk.msra.mxu1 %vm833_vm4, %v832_v7  ;;  %v827_v7 = vld [vmem:[%s4891_s7 + $0x10] sm:$0xff] }
 0x3ac   : > { %3680 = vmatprep.subr.mxu1 %v4132_v38 }
 0x3ae   : > { %3678 = vmatmul.mubr.msk.f32.vlgmr.msra.gmra.mrb[2].mxu1 %vm833_vm4, %v4443_v8  ;;  %v999_v23 = vpop.permute.xlu0 %998 }
 0x3af   : > { %3681 = vmatpush3.msra.mxu1 %v921_v9  ;;  %3682 = vmatprep.mubr.msk.f32.mxu1 %vm4133_vm3, %v4132_v38 }
 0x3b0   : > { %3685 = vmatprep.subr.mxu1 %v4132_v38 }
 0x481   : > { %v905_v14 = vpop.f32.mrb[2].mxu1 }
 0x482   : > { %v906_v15 = vadd.f32 %v905_v14, %v4451_v13  ;;  %v3679_v16 = vpop.f32.mrb[3].mxu1 }
 0x484   : > { %v909_v17 = vsel %vm833_vm4, %v906_v15, -inf }
 0x485   : > { %910 = vmax.xlane.f32.xlu1 %v909_v17 }
 0x512   : > { %v911_v18 = vpop.xlane.xlu1 %910 }
 0x513   : > { %v912_v19 = vsub.f32 %v906_v15, %v911_v18 }
 0x515   : > { %v913_v20 = vmul.f32 1.442695, %v912_v19 }
 0x517   : > { %4023 = vpow2.f32 %v913_v20 }
 0x521   : > { %v4024_v21 = vpop.eup %4023 }
 0x522   : > { %v915_v22 = vsel %vm833_vm4, %v4024_v21, 0.0 }
 0x523   : > { %916 = vadd.xlane.f32.xlu0 %v915_v22 }
 0x539   : > { %996 = vrot.lane.b32.xlu0 %v4443_v8, %s4138_s28 }
 0x5b0   : > { %v917_v24 = vpop.xlane.xlu0 %916 }
 0x5b1   : > { %4025 = vrcp.f32 %v917_v24 }
 0x5b4   : > { %v997_v27 = vpop.permute.xlu0 %996 }
 0x5bb   : > { %v4026_v25 = vpop.eup %4025 }
 0x5bc   : > { %v919_v26 = vmul.f32 %v4026_v25, %v4024_v21 }
 0x5be   : > { %3683 = vmatmul.mubr.msk.f32.vlgmr.msra.gmra.mrb[4].mxu1 %vm833_vm4, %v919_v26  ;;  %v828_v26 = vld [vmem:[%s4891_s7 + $0x18] sm:$0xff] }
 0x5bf   : > { %3686 = vmatpush3.xpose.msk.msra.mxu1 %vm833_vm4, %v999_v23  ;;  %3687 = vmatprep.mubr.msk.f32.mxu1 %vm4133_vm3, %v4132_v38 }
 0x5c0   : > { %3690 = vmatprep.subr.mxu1 %v4132_v38  ;;  %3731 = vmatpush3.msra.mxu0 %v828_v26 }
 0x5c1   : > { %3925 = vmatprep.subr.bf16.mxu0 %v4131_v3 }
 0x5c2   : > { %3688 = vmatmul.mubr.msk.f32.vlgmr.msra.gmra.mrb[6].mxu1 %vm833_vm4, %v997_v27 }
 0x5c3   : > { %3692 = vmatprep.mubr.msk.f32.mxu1 %vm4133_vm3, %v4132_v38 }
 0x691   : > { %v992_v28 = vpop.f32.mrb[4].mxu1 }
 0x692   : > { %v3684_v29 = vpop.f32.mrb[5].mxu1 }
 0x695   : > { %v1070_v30 = vpop.f32.mrb[6].mxu1 }
 0x696   : > { %v1071_v31 = vadd.f32 %v1070_v30, %v4451_v13  ;;  %v3689_v32 = vpop.f32.mrb[7].mxu1 }
 0x698   : > { %v1074_v33 = vsel %vm833_vm4, %v1071_v31, -inf }
 0x699   : > { %1075 = vmax.xlane.f32.xlu1 %v1074_v33 }
 0x6aa   : > { %1085 = vrot.lane.b32.xlu1 %v4433_v5, %s4920_s22  ;;  %s4947_s22 = smov 104  }
 0x6ae   : > { %1309 = vrot.lane.b32.xlu1 %v4433_v5, %s4919_s26  ;;  %s4948_s26 = smov 72  }
 0x6b2   : > { %1307 = vrot.lane.b32.xlu1 %v4443_v8, %s4918_s27  ;;  %s593_s27 = sand.u32 1, %s4121_s30  }
 0x726   : > { %v1076_v34 = vpop.xlane.xlu1 %1075 }
 0x727   : > { %v1077_v35 = vsub.f32 %v1071_v31, %v1076_v34  ;;  %v3506_v34 = vld [vmem:[%s4892_s8] ss:$0 sm:$0xff] }
 0x729   : > { %v1078_v36 = vmul.f32 1.442695, %v1077_v35 }
 0x72a   : > { %v1086_v37 = vpop.permute.xlu1 %1085 }
 0x72b   : > { %4027 = vpow2.f32 %v1078_v36  ;;  %3691 = vmatpush3.msra.mxu1 %v1086_v37 }
 0x72c   : > { %3695 = vmatprep.subr.mxu1 %v4132_v38 }
 0x72e   : > { %v1310_v49 = vpop.permute.xlu1 %1309 }
 0x732   : > { %v1308_v50 = vpop.permute.xlu1 %1307 }
 0x735   : > { %v4028_v39 = vpop.eup %4027 }
 0x736   : > { %v1080_v40 = vsel %vm833_vm4, %v4028_v39, 0.0 }
 0x737   : > { %1081 = vadd.xlane.f32.xlu0 %v1080_v40 }
 0x7c4   : > { %v1082_v41 = vpop.xlane.xlu0 %1081 }
 0x7c5   : > { %4029 = vrcp.f32 %v1082_v41 }
 0x7cf   : > { %v4030_v42 = vpop.eup %4029 }
 0x7d0   : > { %v1084_v44 = vmul.f32 %v4030_v42, %v4028_v39 }
 0x7d2   : > { %3693 = vmatmul.mubr.msk.f32.vlgmr.msra.gmra.mrb[8].mxu1 %vm833_vm4, %v1084_v44 }
 0x7d3   : > { %3696 = vmatpush3.msra.mxu1 %v826_v45  ;;  %3697 = vmatprep.mubr.msk.f32.mxu1 %vm4133_vm3, %v4132_v38  ;;  %v1823_v45 = vld [vmem:[%s4895_s11] sm:$0xff] }
 0x7d4   : > { %3700 = vmatprep.subr.mxu1 %v4132_v38 }
 0x8a5   : > { %v1157_v47 = vpop.f32.mrb[8].mxu1 }
 0x8a6   : > { %v3694_v48 = vpop.f32.mrb[9].mxu1  ;;  %3698 = vmatmul.mubr.msk.f32.vlgmr.msra.gmra.mrb[10].mxu1 %vm833_vm4, %v1157_v47  ;;  %v1825_v47 = vld [vmem:[%s4895_s11 + $0x10] sm:$0xff] }
 0x8a7   : > { %3701 = vmatpush3.msra.mxu1 %v825_v46  ;;  %3702 = vmatprep.mubr.msk.f32.mxu1 %vm4133_vm3, %v4132_v38  ;;  %v1826_v48 = vld [vmem:[%s4895_s11 + $0x18] sm:$0xff] }
 0x8a8   : > { %3705 = vmatprep.subr.mxu1 %v4132_v38 }
 0x8aa   : > { %3703 = vmatmul.mubr.msk.f32.vlgmr.msra.gmra.mrb[12].mxu1 %vm833_vm4, %v992_v28 }
 0x8ab   : > { %3707 = vmatprep.mubr.msk.f32.mxu1 %vm4133_vm3, %v4132_v38 }
 0x8ae   : > { %3706 = vmatpush3.xpose.msk.msra.mxu1 %vm833_vm4, %v1310_v49  ;;  %v3923_v49 = vpack.c.bf16 %v1826_v48, %v1825_v47 }
 0x8af   : > { %3710 = vmatprep.subr.mxu1 %v4132_v38 }
 0x8b1   : > { %3708 = vmatmul.mubr.msk.f32.vlgmr.msra.gmra.mrb[14].mxu1 %vm833_vm4, %v1308_v50 }
 0x8b2   : > { %3712 = vmatprep.mubr.msk.f32.mxu1 %vm4133_vm3, %v4132_v38 }
 0x979   : > { %v1230_v51 = vpop.f32.mrb[10].mxu1 }
 0x97a   : > { %v3699_v52 = vpop.f32.mrb[11].mxu1 }
 0x97d   : > { %v1303_v53 = vpop.f32.mrb[12].mxu1 }
 0x97e   : > { %v1304_v54 = vadd.f32 %v1303_v53, %v1230_v51  ;;  %v3704_v55 = vpop.f32.mrb[13].mxu1 }
 0x984   : > { %v1381_v56 = vpop.f32.mrb[14].mxu1 }
 0x985   : > { %v1382_v57 = vadd.f32 %v1381_v56, %v4451_v13  ;;  %v3709_v58 = vpop.f32.mrb[15].mxu1  ;;  %v3508_v56 = vld [vmem:[%s4894_s10] ss:$0 sm:$0xff] }
 0x987   : > { %v1385_v59 = vsel %vm833_vm4, %v1382_v57, -inf }
 0x988   : > { %1386 = vmax.xlane.f32.xlu1 %v1385_v59  ;;  %v1916_v59 = vld [vmem:[%s4897_s13] sm:$0xff] }
 0xa15   : > { %v1387_v60 = vpop.xlane.xlu1 %1386 }
 0xa16   : > { %v1388_v61 = vsub.f32 %v1382_v57, %v1387_v60  ;;  %v1917_v60 = vld [vmem:[%s4897_s13 + $0x8] sm:$0xff] }
 0xa18   : > { %v1389_v62 = vmul.f32 1.442695, %v1388_v61  ;;  %v3926_v61 = vpack.c.bf16 %v1917_v60, %v1916_v59 }
 0xa1a   : > { %4031 = vpow2.f32 %v1389_v62  ;;  %v1918_v62 = vld [vmem:[%s4897_s13 + $0x10] sm:$0xff] }
 0xa24   : > { %v4032_v63 = vpop.eup %4031 }
 0xa25   : > { %v1391_v0 = vsel %vm833_vm4, %v4032_v63, 0.0 }
 0xa26   : > { %1392 = vadd.xlane.f32.xlu0 %v1391_v0 }
 0xa3c   : > { %1396 = vrot.lane.b32.xlu0 %v4433_v5, %s4917_s23  ;;  %s4946_s23 = smov 48  }
 0xa40   : > { %1548 = vrot.lane.b32.xlu0 %v4433_v5, %s4914_s0  ;;  %s4945_s0 = smov 64  }
 0xa44   : > { %1546 = vrot.lane.b32.xlu0 %v4443_v8, %s4916_s19  ;;  %s4951_s19 = smov %s4950_s21 }
 0xab3   : > { %v1393_v1 = vpop.xlane.xlu0 %1392 }
 0xab4   : > { %4033 = vrcp.f32 %v1393_v1  ;;  %v1920_v1 = vld [vmem:[%s4897_s13 + $0x20] sm:$0xff] }
 0xab7   : > { %v1397_v2 = vpop.permute.xlu0 %1396 }
 0xab8   : > { %3711 = vmatpush3.msra.mxu1 %v1397_v2  ;;  %v1921_v2 = vld [vmem:[%s4897_s13 + $0x28] sm:$0xff] }
 0xab9   : > { %3715 = vmatprep.subr.mxu1 %v4132_v38 }
 0xabb   : > { %v1549_v8 = vpop.permute.xlu0 %1548 }
 0xabe   : > { %v4034_v4 = vpop.eup %4033 }
 0xabf   : > { %v1395_v6 = vmul.f32 %v4034_v4, %v4032_v63  ;;  %v1547_v11 = vpop.permute.xlu0 %1546  ;;  %v1919_v63 = vld [vmem:[%s4897_s13 + $0x18] sm:$0xff]  ;;  %v3932_v4 = vpack.c.bf16 %v1921_v2, %v1920_v1 }
 0xac0   : > { %v3929_v0 = vpack.c.bf16 %v1919_v63, %v1918_v62 }
 0xac1   : > { %3713 = vmatmul.mubr.msk.f32.vlgmr.msra.gmra.mrb[16].mxu1 %vm833_vm4, %v1395_v6  ;;  %v1922_v6 = vld [vmem:[%s4897_s13 + $0x30] sm:$0xff] }
 0xac2   : > { %3716 = vmatpush3.msra.mxu1 %v827_v7  ;;  %3717 = vmatprep.mubr.msk.f32.mxu1 %vm4133_vm3, %v4132_v38  ;;  %v1923_v7 = vld [vmem:[%s4897_s13 + $0x38] sm:$0xff] }
 0xac3   : > { %3720 = vmatprep.subr.mxu1 %v4132_v38 }
 0xb94   : > { %v1468_v9 = vpop.f32.mrb[16].mxu1 }
 0xb95   : > { %v3714_v10 = vpop.f32.mrb[17].mxu1  ;;  %3718 = vmatmul.mubr.msk.f32.vlgmr.msra.gmra.mrb[18].mxu1 %vm833_vm4, %v1468_v9  ;;  %v3509_v9 = vld [vmem:[%s4896_s12] ss:$0 sm:$0xff] }
 0xb96   : > { %3721 = vmatpush3.xpose.msk.msra.mxu1 %vm833_vm4, %v1549_v8  ;;  %3722 = vmatprep.mubr.msk.f32.mxu1 %vm4133_vm3, %v4132_v38  ;;  %v3935_v8 = vpack.c.bf16 %v1923_v7, %v1922_v6 }
 0xb97   : > { %3725 = vmatprep.subr.mxu1 %v4132_v38 }
 0xb99   : > { %3723 = vmatmul.mubr.msk.f32.vlgmr.msra.gmra.mrb[20].mxu1 %vm833_vm4, %v1547_v11 }
 0xb9a   : > { %3727 = vmatprep.mubr.msk.f32.mxu1 %vm4133_vm3, %v4132_v38 }
 0xc68   : > { %v1541_v12 = vpop.f32.mrb[18].mxu1 }
 0xc69   : > { %v1545_v14 = vadd.f32 %v1541_v12, %v1304_v54  ;;  %v3719_v15 = vpop.f32.mrb[19].mxu1  ;;  %v3507_v54 = vld [vmem:[%s4893_s9] ss:$0 sm:$0xff] }
 0xc6c   : > { %v1620_v16 = vpop.f32.mrb[20].mxu1 }
 0xc6d   : > { %v1621_v17 = vadd.f32 %v1620_v16, %v4451_v13  ;;  %v3724_v18 = vpop.f32.mrb[21].mxu1 }
 0xc6f   : > { %v1624_v19 = vsel %vm833_vm4, %v1621_v17, -inf }
 0xc70   : > { %1625 = vmax.xlane.f32.xlu1 %v1624_v19 }
 0xc81   : > { %1635 = vrot.lane.b32.xlu1 %v4433_v5, %s4915_s24 }
 0xcfd   : > { %v1626_v20 = vpop.xlane.xlu1 %1625 }
 0xcfe   : > { %v1627_v21 = vsub.f32 %v1621_v17, %v1626_v20 }
 0xd00   : > { %v1628_v22 = vmul.f32 1.442695, %v1627_v21 }
 0xd01   : > { %v1636_v23 = vpop.permute.xlu1 %1635 }
 0xd02   : > { %4035 = vpow2.f32 %v1628_v22  ;;  %3726 = vmatpush3.msra.mxu1 %v1636_v23 }
 0xd03   : > { %3919 = vmatprep.subr.bf16.mxu1 %v4131_v3 }
 0xd0c   : > { %v4036_v24 = vpop.eup %4035 }
 0xd0d   : > { %v1630_v25 = vsel %vm833_vm4, %v4036_v24, 0.0 }
 0xd0e   : > { %1631 = vadd.xlane.f32.xlu0 %v1630_v25 }
 0xd9b   : > { %v1632_v5 = vpop.xlane.xlu0 %1631 }
 0xd9c   : > { %4037 = vrcp.f32 %v1632_v5 }
 0xda6   : > { %v4038_v27 = vpop.eup %4037 }
 0xda7   : > { %v1634_v28 = vmul.f32 %v4038_v27, %v4036_v24  ;;  %v3512_v24 = vld [vmem:[%s4898_s14] ss:$0 sm:$0xff] }
 0xda9   : > { %3728 = vmatmul.mubr.msk.f32.vlgmr.msra.gmra.mrb[22].mxu1 %vm833_vm4, %v1634_v28 }
 0xdaa   : > { %3743 = vmatprep.mubr.msk.f32.mxu1 %vm4133_vm3, %v4132_v38 }
 0xe7c   : > { %v1707_v29 = vpop.f32.mrb[22].mxu1 }
 0xe7d   : > { %v3729_v30 = vpop.f32.mrb[23].mxu1  ;;  %3733 = vmatmul.mubr.msk.f32.vlgmr.msra.gmra.mrb[2].mxu0 %vm833_vm4, %v1707_v29 }
 0xe7e   : > { %3762 = vmatprep.mubr.msk.f32.mxu0 %vm4133_vm3, %v4132_v38  ;;  %3927 = vmatpush3.bf16.msra.mxu0 %v3926_v61 }
 0xe7f   : > { %3928 = vmatprep.subr.bf16.mxu0 %v4131_v3 }
 0xe82   : > { %3930 = vmatpush3.bf16.msra.mxu0 %v3929_v0 }
 0xe83   : > { %3931 = vmatprep.subr.bf16.mxu0 %v4131_v3 }
 0xe86   : > { %3933 = vmatpush3.bf16.msra.mxu0 %v3932_v4 }
 0xe87   : > { %3934 = vmatprep.subr.bf16.mxu0 %v4131_v3 }
 0xe8a   : > { %3936 = vmatpush3.bf16.msra.mxu0 %v3935_v8 }
 0xe8b   : > { %3781 = vmatprep.subr.mxu0 %v4132_v38 }
 0xf50   : > { %v1780_v31 = vpop.f32.mrb[2].mxu0 }
 0xf51   : > { %v1784_v32 = vadd.f32 %v1780_v31, %v1545_v14  ;;  %v3734_v33 = vpop.f32.mrb[3].mxu0 }
 0xf52   : > { %v3517_v33 = vld [vmem:[%s4939_s5 + $0x20] sm:$0xff] }
 0xf53   : > { %v1785_v35 = vadd.f32 %v1784_v32, %v4397_v43  ;;  %v1824_v43 = vld [vmem:[%s4895_s11 + $0x8] sm:$0xff] }
 0xf54   : > { %v3920_v46 = vpack.c.bf16 %v1824_v43, %v1823_v45  ;;  %v3515_v45 = vld [vmem:[%s4940_s25 + $0x1] ss:$0 sm:$0xff] }
 0xf55   : > { %v4543_v36 = vadd.f32 %v3506_v34, %v1785_v35  ;;  %v3518_v34 = vld [vmem:[%s4939_s5 + $0x28] sm:$0xff] }
 0xf56   : > { %3921 = vmatpush3.bf16.msra.mxu1 %v3920_v46  ;;  %v3938_v35 = vpack.c.bf16 %v3518_v34, %v3517_v33  ;;  %v3516_v46 = vld [vmem:[%s4941_s4 + $0x1] ss:$0 sm:$0xff] }
 0xf57   : > { %v1796_v37 = vsel %vm712_vm2, %v4543_v36, 0.0  ;;  %3922 = vmatprep.subr.bf16.mxu1 %v4131_v3 }
 0xf58   : > { %1797 = vadd.xlane.f32.xlu1 %v1796_v37  ;;  %v3520_v37 = vld [vmem:[%s4939_s5 + $0x38] sm:$0xff] }
 0xf5a   : > { %3924 = vmatpush3.bf16.msra.mxu1 %v3923_v49  ;;  %v3522_v49 = vld [vmem:[%s4890_s6 + $0x1] ss:$0 sm:$0xff] }
 0xf5b   : > { %3937 = vmatprep.subr.bf16.mxu1 %v4131_v3 }
 0xfe5   : > { %v1798_v39 = vpop.xlane.xlu1 %1797 }
 0xfe6   : > { %v1799_v40 = vmul.f32 0.03125, %v1798_v39 }
 0xfe8   : > { %v1800_v41 = vsub.f32 %v4543_v36, %v1799_v40 }
 0xfea   : > { %v1801_v42 = vmul.f32 %v1800_v41, %v1800_v41 }
 0xfec   : > { %v1802_v44 = vsel %vm712_vm2, %v1801_v42, 0.0 }
 0xfed   : > { %1803 = vadd.xlane.f32.xlu0 %v1802_v44 }
0x107a   : > { %v1804_v50 = vpop.xlane.xlu0 %1803 }
0x107b   : > { %v1805_v51 = vmul.f32 0.03125, %v1804_v50 }
0x107d   : > { %v1806_v52 = vadd.f32 1e-12, %v1805_v51 }
0x107f   : > { %4039 = vrsqrt.f32 %v1806_v52 }
0x1089   : > { %v4040_v53 = vpop.eup %4039 }
0x108a   : > { %v1808_v55 = vmul.f32 %v4040_v53, %v1800_v41 }
0x108c   : > { %v1815_v57 = vmul.f32 %v3507_v54, %v1808_v55 }
0x108e   : > { %v1822_v58 = vadd.f32 %v3508_v56, %v1815_v57 }
0x1090   : > { %3744 = vmatmul.mubr.msk.f32.vlgmr.msra.gmra.mrb[24].mxu1 %vm712_vm2, %v1822_v58 }
0x1091   : > { %3773 = vmatprep.mubr.msk.f32.mxu1 %vm4133_vm3, %v4132_v38  ;;  %3939 = vmatpush3.bf16.msra.mxu1 %v3938_v35 }
0x1092   : > { %3940 = vmatprep.subr.bf16.mxu1 %v4131_v3 }
0x1163   : > { %v1903_v10 = vpop.f32.mrb[24].mxu1 }
0x1164   : > { %v1904_v11 = vadd.f32 %v3509_v9, %v1903_v10  ;;  %v3745_v12 = vpop.f32.mrb[25].mxu1 }
0x1166   : > { %v1907_v14 = vmul.f32 %v1904_v11, %v1904_v11 }
0x1168   : > { %v1908_v15 = vmul.f32 %v1907_v14, %v1904_v11  ;;  %v3525_v14 = vld [vmem:[%s4891_s7 + $0x28] sm:$0xff] }
0x116a   : > { %v1909_v16 = vmul.f32 0.044715, %v1908_v15 }
0x116c   : > { %v1910_v17 = vadd.f32 %v1909_v16, %v1904_v11 }
0x116e   : > { %v1911_v18 = vmul.f32 0.7978846, %v1910_v17 }
0x1170   : > { %4041 = vtanh.f32 %v1911_v18 }
0x117a   : > { %v4042_v19 = vpop.eup %4041 }
0x117b   : > { %v1913_v20 = vadd.f32 1.0, %v4042_v19 }
0x117d   : > { %v1914_v21 = vmul.f32 0.5, %v1913_v20 }
0x117f   : > { %v1915_v22 = vmul.f32 %v1914_v21, %v1904_v11 }
0x1181   : > { %3763 = vmatmul.mubr.msk.f32.vlgmr.msra.gmra.mrb[4].mxu0 %vm1924_vm6, %v1915_v22 }
0x1182   : > { %3783 = vmatprep.mubr.msk.f32.mxu0 %vm4133_vm3, %v4132_v38 }
0x1254   : > { %v1994_v23 = vpop.f32.mrb[4].mxu0 }
0x1255   : > { %v1998_v25 = vadd.f32 %v1994_v23, %v4543_v36  ;;  %v3764_v26 = vpop.f32.mrb[5].mxu0  ;;  %v3519_v36 = vld [vmem:[%s4939_s5 + $0x30] sm:$0xff]  ;;  %v3524_v23 = vld [vmem:[%s4891_s7 + $0x20] sm:$0xff] }
0x1256   : > { %v3941_v39 = vpack.c.bf16 %v3520_v37, %v3519_v36 }
0x1257   : > { %v4610_v5 = vadd.f32 %v3512_v24, %v1998_v25 }
0x1258   : > { %3942 = vmatpush3.bf16.msra.mxu1 %v3941_v39 }
0x1259   : > { %v2011_v27 = vsel %vm712_vm2, %v4610_v5, 0.0  ;;  %3776 = vmatprep.subr.mxu1 %v4132_v38 }
0x125a   : > { %2012 = vadd.xlane.f32.xlu0 %v2011_v27 }
0x12e7   : > { %v2013_v28 = vpop.xlane.xlu0 %2012 }
0x12e8   : > { %v2014_v29 = vmul.f32 0.03125, %v2013_v28 }
0x12ea   : > { %v2015_v30 = vsub.f32 %v4610_v5, %v2014_v29 }
0x12ec   : > { %v2016_v31 = vmul.f32 %v2015_v30, %v2015_v30 }
0x12ee   : > { %v2017_v32 = vsel %vm712_vm2, %v2016_v31, 0.0 }
0x12ef   : > { %2018 = vadd.xlane.f32.xlu0 %v2017_v32 }
0x137c   : > { %v2019_v40 = vpop.xlane.xlu0 %2018 }
0x137d   : > { %v2020_v41 = vmul.f32 0.03125, %v2019_v40 }
0x137f   : > { %v2021_v42 = vadd.f32 1e-12, %v2020_v41 }
0x1381   : > { %4043 = vrsqrt.f32 %v2021_v42 }
0x138b   : > { %v4044_v44 = vpop.eup %4043 }
0x138c   : > { %v2023_v43 = vmul.f32 %v4044_v44, %v2015_v30 }
0x138e   : > { %v2030_v47 = vmul.f32 %v3515_v45, %v2023_v43 }
0x1390   : > { %v2037_v48 = vadd.f32 %v3516_v46, %v2030_v47 }
0x1392   : > { %3774 = vmatmul.mubr.msk.f32.vlgmr.msra.gmra.mrb[26].mxu1 %vm712_vm2, %v2037_v48 }
0x1393   : > { %3778 = vmatprep.mubr.msk.f32.mxu1 %vm4133_vm3, %v4132_v38 }
0x1465   : > { %v2120_v50 = vpop.f32.mrb[26].mxu1 }
0x1466   : > { %v4642_v51 = vadd.f32 %v3522_v49, %v2120_v50  ;;  %v3775_v52 = vpop.f32.mrb[27].mxu1 }
0x1467   : > { %v3526_v52 = vld [vmem:[%s4891_s7 + $0x30] sm:$0xff] }
0x1468   : > { %2297 = vrot.lane.b32.xlu1 %v4642_v51, %s4136_s2  ;;  %2131 = vrot.lane.b32.xlu0 %v4642_v51, %s4135_s20  ;;  %v4649_v53 = vmul.f32 0.35355338, %v4642_v51  ;;  %s4942_s20 = smov 56   ;;  %s4943_s2 = smov 80  }
0x146c   : > { %2295 = vrot.lane.b32.xlu0 %v4649_v53, %s4138_s28  ;;  %s4944_s28 = smov 112  }
0x14da   : > { %v2132_v54 = vpop.permute.xlu0 %2131  ;;  %v2298_v55 = vpop.permute.xlu1 %2297 }
0x14db   : > { %3777 = vmatpush3.xpose.msk.msra.mxu1 %vm833_vm4, %v2132_v54 }
0x14dc   : > { %3786 = vmatprep.subr.mxu1 %v4132_v38 }
0x14de   : > { %3779 = vmatmul.mubr.msk.f32.vlgmr.msra.gmra.mrb[28].mxu1 %vm833_vm4, %v4649_v53  ;;  %v2296_v56 = vpop.permute.xlu0 %2295 }
0x14df   : > { %3787 = vmatpush3.xpose.msk.msra.mxu1 %vm833_vm4, %v2298_v55  ;;  %3788 = vmatprep.mubr.msk.f32.mxu1 %vm4133_vm3, %v4132_v38 }
0x14e0   : > { %3796 = vmatprep.subr.mxu1 %v4132_v38 }
0x14e2   : > { %3789 = vmatmul.mubr.msk.f32.vlgmr.msra.gmra.mrb[30].mxu1 %vm833_vm4, %v2296_v56 }
0x14e3   : > { %3798 = vmatprep.mubr.msk.f32.mxu1 %vm4133_vm3, %v4132_v38  ;;  %3797 = vmatpush3.msra.mxu1 %v3525_v14  ;;  %v3545_v14 = vld [vmem:[%s4892_s8 + $0x1] ss:$0 sm:$0xff] }
0x14e4   : > { %3806 = vmatprep.subr.mxu1 %v4132_v38 }
0x15b1   : > { %v2204_v57 = vpop.f32.mrb[28].mxu1 }
0x15b2   : > { %v2205_v58 = vadd.f32 %v2204_v57, %v4451_v13  ;;  %v3780_v59 = vpop.f32.mrb[29].mxu1 }
0x15b4   : > { %v2208_v60 = vsel %vm833_vm4, %v2205_v58, -inf }
0x15b5   : > { %2209 = vmax.xlane.f32.xlu0 %v2208_v60  ;;  %v2369_v61 = vpop.f32.mrb[30].mxu1 }
0x15b6   : > { %v2370_v62 = vadd.f32 %v2369_v61, %v4451_v13  ;;  %v3790_v63 = vpop.f32.mrb[31].mxu1 }
0x15b8   : > { %v2373_v0 = vsel %vm833_vm4, %v2370_v62, -inf }
0x15b9   : > { %2374 = vmax.xlane.f32.xlu1 %v2373_v0  ;;  %v3527_v0 = vld [vmem:[%s4891_s7 + $0x38] sm:$0xff] }
0x15ca   : > { %2384 = vrot.lane.b32.xlu1 %v4642_v51, %s4942_s20  ;;  %s594_s20 = scalar_lea.vmem [#allocation2], %s593_s27 }
0x15ce   : > { %2608 = vrot.lane.b32.xlu1 %v4642_v51, %s4943_s2  ;;  %s3423_s2 = sshll.u32 %s594_s20, 4  ;;  %s4844_s2 = int_to_ptr.vmem [resolvable:$true] %s3423_s2 }
0x15d2   : > { %2606 = vrot.lane.b32.xlu1 %v4649_v53, %s4944_s28  ;;  %s4949_s28 = smov 40  }
0x1642   : > { %v2210_v1 = vpop.xlane.xlu0 %2209 }
0x1643   : > { %v2211_v2 = vsub.f32 %v2205_v58, %v2210_v1 }
0x1645   : > { %v2212_v4 = vmul.f32 1.442695, %v2211_v2 }
0x1646   : > { %v2375_v6 = vpop.xlane.xlu1 %2374 }
0x1647   : > { %4045 = vpow2.f32 %v2212_v4  ;;  %v2376_v7 = vsub.f32 %v2370_v62, %v2375_v6 }
0x1649   : > { %v2377_v8 = vmul.f32 1.442695, %v2376_v7 }
0x164a   : > { %v2385_v20 = vpop.permute.xlu1 %2384 }
0x164b   : > { %4047 = vpow2.f32 %v2377_v8 }
0x164e   : > { %v2609_v26 = vpop.permute.xlu1 %2608 }
0x1651   : > { %v4046_v9 = vpop.eup %4045 }
0x1652   : > { %v2214_v10 = vsel %vm833_vm4, %v4046_v9, 0.0  ;;  %v2607_v29 = vpop.permute.xlu1 %2606 }
0x1653   : > { %2215 = vadd.xlane.f32.xlu0 %v2214_v10 }
0x1655   : > { %v4048_v11 = vpop.eup %4047 }
0x1656   : > { %v2379_v12 = vsel %vm833_vm4, %v4048_v11, 0.0 }
0x1657   : > { %2380 = vadd.xlane.f32.xlu0 %v2379_v12 }
0x166d   : > { %2219 = vrot.lane.b32.xlu0 %v4642_v51, %s4945_s0 }
0x16e0   : > { %v2216_v15 = vpop.xlane.xlu0 %2215 }
0x16e1   : > { %4049 = vrcp.f32 %v2216_v15 }
0x16e4   : > { %v2381_v16 = vpop.xlane.xlu0 %2380 }
0x16e5   : > { %4051 = vrcp.f32 %v2381_v16 }
0x16e8   : > { %v2220_v17 = vpop.permute.xlu0 %2219 }
0x16e9   : > { %3782 = vmatpush3.msra.mxu0 %v2220_v17 }
0x16ea   : > { %3791 = vmatprep.subr.mxu0 %v4132_v38 }
0x16eb   : > { %v4050_v18 = vpop.eup %4049 }
0x16ec   : > { %v2218_v19 = vmul.f32 %v4050_v18, %v4046_v9 }
0x16ee   : > { %3784 = vmatmul.mubr.msk.f32.vlgmr.msra.gmra.mrb[6].mxu0 %vm833_vm4, %v2218_v19 }
0x16ef   : > { %v4052_v21 = vpop.eup %4051  ;;  %3792 = vmatpush3.msra.mxu0 %v2385_v20  ;;  %3793 = vmatprep.mubr.msk.f32.mxu0 %vm4133_vm3, %v4132_v38 }
0x16f0   : > { %v2383_v22 = vmul.f32 %v4052_v21, %v4048_v11  ;;  %3801 = vmatprep.subr.mxu0 %v4132_v38 }
0x16f2   : > { %3794 = vmatmul.mubr.msk.f32.vlgmr.msra.gmra.mrb[8].mxu0 %vm833_vm4, %v2383_v22 }
0x16f3   : > { %3803 = vmatprep.mubr.msk.f32.mxu0 %vm4133_vm3, %v4132_v38  ;;  %3802 = vmatpush3.msra.mxu0 %v3524_v23  ;;  %v3550_v23 = vld [vmem:[%s4895_s11 + $0x20] sm:$0xff] }
0x16f4   : > { %3811 = vmatprep.subr.mxu0 %v4132_v38 }
0x17c1   : > { %v2291_v24 = vpop.f32.mrb[6].mxu0 }
0x17c2   : > { %v3785_v25 = vpop.f32.mrb[7].mxu0  ;;  %3804 = vmatmul.mubr.msk.f32.vlgmr.msra.gmra.mrb[10].mxu0 %vm833_vm4, %v2291_v24 }
0x17c3   : > { %3813 = vmatprep.mubr.msk.f32.mxu0 %vm4133_vm3, %v4132_v38  ;;  %v3552_v25 = vld [vmem:[%s4895_s11 + $0x30] sm:$0xff] }
0x17c5   : > { %v2456_v27 = vpop.f32.mrb[8].mxu0 }
0x17c6   : > { %v3795_v28 = vpop.f32.mrb[9].mxu0  ;;  %3799 = vmatmul.mubr.msk.f32.vlgmr.msra.gmra.mrb[32].mxu1 %vm833_vm4, %v2456_v27 }
0x17c7   : > { %3807 = vmatpush3.xpose.msk.msra.mxu1 %vm833_vm4, %v2609_v26  ;;  %3808 = vmatprep.mubr.msk.f32.mxu1 %vm4133_vm3, %v4132_v38  ;;  %v3553_v26 = vld [vmem:[%s4895_s11 + $0x38] sm:$0xff] }
0x17c8   : > { %3816 = vmatprep.subr.mxu1 %v4132_v38  ;;  %v3947_v27 = vpack.c.bf16 %v3553_v26, %v3552_v25 }
0x17ca   : > { %3809 = vmatmul.mubr.msk.f32.vlgmr.msra.gmra.mrb[34].mxu1 %vm833_vm4, %v2607_v29 }
0x17cb   : > { %3818 = vmatprep.mubr.msk.f32.mxu1 %vm4133_vm3, %v4132_v38  ;;  %3817 = vmatpush3.msra.mxu1 %v3526_v52 }
0x17cc   : > { %3826 = vmatprep.subr.mxu1 %v4132_v38 }
0x1895   : > { %v2602_v30 = vpop.f32.mrb[10].mxu0 }
0x1896   : > { %v3805_v31 = vpop.f32.mrb[11].mxu0 }
0x1899   : > { %v2529_v32 = vpop.f32.mrb[32].mxu1 }
0x189a   : > { %v2603_v33 = vadd.f32 %v2602_v30, %v2529_v32  ;;  %v3800_v34 = vpop.f32.mrb[33].mxu1  ;;  %v3548_v32 = vld [vmem:[%s4893_s9 + $0x1] ss:$0 sm:$0xff] }
0x189b   : > { %v3549_v34 = vld [vmem:[%s4894_s10 + $0x1] ss:$0 sm:$0xff] }
0x189d   : > { %v2680_v35 = vpop.f32.mrb[34].mxu1 }
0x189e   : > { %v2681_v36 = vadd.f32 %v2680_v35, %v4451_v13  ;;  %v3810_v37 = vpop.f32.mrb[35].mxu1 }
0x189f   : > { %v3557_v37 = vld [vmem:[%s4897_s13 + $0x40] sm:$0xff] }
0x18a0   : > { %v2684_v39 = vsel %vm833_vm4, %v2681_v36, -inf }
0x18a1   : > { %2685 = vmax.xlane.f32.xlu0 %v2684_v39  ;;  %v3558_v39 = vld [vmem:[%s4897_s13 + $0x48] sm:$0xff] }
0x18b7   : > { %2695 = vrot.lane.b32.xlu0 %v4642_v51, %s4946_s23  ;;  %s3411_s23 = scalar_lea.sflag [#allocation3], %s593_s27 }
0x18bb   : > { %2845 = vrot.lane.b32.xlu0 %v4649_v53, %s4947_s22  ;;  %s4067_s22 = scalar_lea.vmem %s4844_s2, 16 }
0x18bc   : > { %p4068_p11 = scmp.ne.s32.totalorder %s4844_s2, %s4067_s22 }
0x18be   : > { %p4069_p12 = pnand %p4068_p11, %p4285_p5 }
0x18c0   : > { %p4070_p13 = pneg %p4069_p12 }
0x192e   : > { %v2686_v40 = vpop.xlane.xlu0 %2685 }
0x192f   : > { %v2687_v41 = vsub.f32 %v2681_v36, %v2686_v40  ;;  %v3950_v40 = vpack.c.bf16 %v3558_v39, %v3557_v37 }
0x1931   : > { %v2688_v42 = vmul.f32 1.442695, %v2687_v41  ;;  %v3559_v41 = vld [vmem:[%s4897_s13 + $0x50] sm:$0xff] }
0x1932   : > { %v2696_v44 = vpop.permute.xlu0 %2695 }
0x1933   : > { %4053 = vpow2.f32 %v2688_v42  ;;  %3812 = vmatpush3.msra.mxu0 %v2696_v44  ;;  %v3561_v44 = vld [vmem:[%s4897_s13 + $0x60] sm:$0xff] }
0x1934   : > { %3821 = vmatprep.subr.mxu0 %v4132_v38 }
0x1936   : > { %v2846_v50 = vpop.permute.xlu0 %2845 }
0x193d   : > { %v4054_v45 = vpop.eup %4053 }
0x193e   : > { %v2690_v43 = vsel %vm833_vm4, %v4054_v45, 0.0 }
0x193f   : > { %2691 = vadd.xlane.f32.xlu1 %v2690_v43 }
0x1950   : > { %2847 = vrot.lane.b32.xlu1 %v4642_v51, %s4948_s26  ;;  %s3569_s26 = sshll.u32 %s4268_s1, 4  ;;  %s4146_s1 = smov [#allocation2]  }
0x1951   : > { %s4842_s24 = scalar_lea.hbm %s4950_s21, %s3569_s26  ;;  %s4071_s4 = sshll.u32 %s4146_s1, 4  ;;  %s4072_s4 = int_to_ptr.vmem [resolvable:$false] %s4071_s4 }
0x1952   : > { %s4073_s5 = scalar_lea.vmem %s4072_s4, 32  ;;  %p4074_p0 = scmp.lt.s32.totalorder %s4844_s2, %s4072_s4 }
0x1953   : > { %p4075_p1 = scmp.lt.s32.totalorder %s4073_s5, %s4067_s22 }
0x1955   : > { %p4076_p2 = por %p4075_p1, %p4074_p0 }
0x1957   : > { %p4077_p3 = pnand %p4076_p2, %p4070_p13 }
0x19cc   : > { %v2692_v46 = vpop.xlane.xlu1 %2691 }
0x19cd   : > { %4055 = vrcp.f32 %v2692_v46  ;;  %v3563_v46 = vld [vmem:[%s4897_s13 + $0x70] sm:$0xff] }
0x19d0   : > { %v2848_v49 = vpop.permute.xlu1 %2847 }
0x19d7   : > { %v4056_v47 = vpop.eup %4055 }
0x19d8   : > { %v2694_v48 = vmul.f32 %v4056_v47, %v4054_v45  ;;  %v3562_v45 = vld [vmem:[%s4897_s13 + $0x68] sm:$0xff]  ;;  %v3564_v47 = vld [vmem:[%s4897_s13 + $0x78] sm:$0xff] }
0x19d9   : > { %v3956_v43 = vpack.c.bf16 %v3562_v45, %v3561_v44 }
0x19da   : > { %3814 = vmatmul.mubr.msk.f32.vlgmr.msra.gmra.mrb[12].mxu0 %vm833_vm4, %v2694_v48  ;;  %v3959_v48 = vpack.c.bf16 %v3564_v47, %v3563_v46 }
0x19db   : > { %3822 = vmatpush3.xpose.msk.msra.mxu0 %vm833_vm4, %v2848_v49  ;;  %3823 = vmatprep.mubr.msk.f32.mxu0 %vm4133_vm3, %v4132_v38  ;;  %v3555_v49 = vld [vmem:[%s4896_s12 + $0x1] ss:$0 sm:$0xff] }
0x19dc   : > { %3831 = vmatprep.subr.mxu0 %v4132_v38 }
0x19de   : > { %3824 = vmatmul.mubr.msk.f32.vlgmr.msra.gmra.mrb[14].mxu0 %vm833_vm4, %v2846_v50 }
0x19df   : > { %3833 = vmatprep.mubr.msk.f32.mxu0 %vm4133_vm3, %v4132_v38  ;;  %3832 = vmatpush3.msra.mxu0 %v3527_v0  ;;  %v3567_v0 = vld [vmem:[%s4898_s14 + $0x1] ss:$0 sm:$0xff] }
0x19e0   : > { %3949 = vmatprep.subr.bf16.mxu0 %v4131_v3 }
0x1aad   : > { %v2767_v53 = vpop.f32.mrb[12].mxu0 }
0x1aae   : > { %v3815_v54 = vpop.f32.mrb[13].mxu0  ;;  %3819 = vmatmul.mubr.msk.f32.vlgmr.msra.gmra.mrb[36].mxu1 %vm833_vm4, %v2767_v53 }
0x1aaf   : > { %3828 = vmatprep.mubr.msk.f32.mxu1 %vm4133_vm3, %v4132_v38 }
0x1ab1   : > { %v2919_v55 = vpop.f32.mrb[14].mxu0 }
0x1ab2   : > { %v2920_v56 = vadd.f32 %v2919_v55, %v4451_v13  ;;  %v3825_v57 = vpop.f32.mrb[15].mxu0 }
0x1ab4   : > { %v2923_v58 = vsel %vm833_vm4, %v2920_v56, -inf }
0x1ab5   : > { %2924 = vmax.xlane.f32.xlu1 %v2923_v58 }
0x1b42   : > { %v2925_v59 = vpop.xlane.xlu1 %2924 }
0x1b43   : > { %v2926_v60 = vsub.f32 %v2920_v56, %v2925_v59 }
0x1b45   : > { %v2927_v61 = vmul.f32 1.442695, %v2926_v60 }
0x1b47   : > { %4057 = vpow2.f32 %v2927_v61 }
0x1b51   : > { %v4058_v62 = vpop.eup %4057 }
0x1b52   : > { %v2929_v63 = vsel %vm833_vm4, %v4058_v62, 0.0 }
0x1b53   : > { %2930 = vadd.xlane.f32.xlu0 %v2929_v63 }
0x1b69   : > { %2934 = vrot.lane.b32.xlu0 %v4642_v51, %s4949_s28 }
0x1b81   : > { %v2840_v13 = vpop.f32.mrb[36].mxu1 }
0x1b82   : > { %v2844_v1 = vadd.f32 %v2840_v13, %v2603_v33  ;;  %v3820_v2 = vpop.f32.mrb[37].mxu1 }
0x1be0   : > { %v2931_v4 = vpop.xlane.xlu0 %2930 }
0x1be1   : > { %4059 = vrcp.f32 %v2931_v4 }
0x1be4   : > { %v2935_v6 = vpop.permute.xlu0 %2934 }
0x1be5   : > { %3827 = vmatpush3.msra.mxu1 %v2935_v6 }
0x1be6   : > { %3943 = vmatprep.subr.bf16.mxu1 %v4131_v3 }
0x1beb   : > { %v4060_v7 = vpop.eup %4059 }
0x1bec   : > { %v2933_v8 = vmul.f32 %v4060_v7, %v4058_v62 }
0x1bee   : > { %3829 = vmatmul.mubr.msk.f32.vlgmr.msra.gmra.mrb[38].mxu1 %vm833_vm4, %v2933_v8 }
0x1bef   : > { %3844 = vmatprep.mubr.msk.f32.mxu1 %vm4133_vm3, %v4132_v38 }
0x1cc1   : > { %v3006_v51 = vpop.f32.mrb[38].mxu1 }
0x1cc2   : > { %v3830_v9 = vpop.f32.mrb[39].mxu1  ;;  %3834 = vmatmul.mubr.msk.f32.vlgmr.msra.gmra.mrb[16].mxu0 %vm833_vm4, %v3006_v51 }
0x1cc3   : > { %3863 = vmatprep.mubr.msk.f32.mxu0 %vm4133_vm3, %v4132_v38  ;;  %3951 = vmatpush3.bf16.msra.mxu0 %v3950_v40 }
0x1cc4   : > { %3952 = vmatprep.subr.bf16.mxu0 %v4131_v3 }
0x1d95   : > { %v3079_v10 = vpop.f32.mrb[16].mxu0 }
0x1d96   : > { %v3083_v11 = vadd.f32 %v3079_v10, %v2844_v1  ;;  %v3835_v12 = vpop.f32.mrb[17].mxu0  ;;  %v3330_v10 = vld [vmem:[%s4901_s17] sm:$0xff] }
0x1d98   : > { %v3084_v15 = vadd.f32 %v3083_v11, %v4610_v5  ;;  %v3551_v5 = vld [vmem:[%s4895_s11 + $0x28] sm:$0xff] }
0x1d99   : > { %v3944_v24 = vpack.c.bf16 %v3551_v5, %v3550_v23  ;;  %v3331_v11 = vld [vmem:[%s4901_s17 + $0x8] sm:$0xff] }
0x1d9a   : > { %v4750_v16 = vadd.f32 %v3545_v14, %v3084_v15  ;;  %v3962_v12 = vpack.c.bf16 %v3331_v11, %v3330_v10  ;;  %v3332_v14 = vld [vmem:[%s4901_s17 + $0x10] sm:$0xff]  ;;  %v3333_v15 = vld [vmem:[%s4901_s17 + $0x18] sm:$0xff] }
0x1d9b   : > { %3945 = vmatpush3.bf16.msra.mxu1 %v3944_v24  ;;  %v3334_v24 = vld [vmem:[%s4902_s18] sm:$0x1] }
0x1d9c   : > { %v3098_v17 = vsel %vm712_vm2, %v4750_v16, 0.0  ;;  %3946 = vmatprep.subr.bf16.mxu1 %v4131_v3 }
0x1d9d   : > { %3099 = vadd.xlane.f32.xlu1 %v3098_v17 }
0x1d9f   : > { %3948 = vmatpush3.bf16.msra.mxu1 %v3947_v27 }
0x1da0   : > { %3961 = vmatprep.subr.bf16.mxu1 %v4131_v3 }
0x1e2a   : > { %v3100_v18 = vpop.xlane.xlu1 %3099 }
0x1e2b   : > { %v3101_v19 = vmul.f32 0.03125, %v3100_v18 }
0x1e2d   : > { %v3102_v20 = vsub.f32 %v4750_v16, %v3101_v19 }
0x1e2f   : > { %v3103_v21 = vmul.f32 %v3102_v20, %v3102_v20 }
0x1e31   : > { %v3104_v22 = vsel %vm712_vm2, %v3103_v21, 0.0 }
0x1e32   : > { %3105 = vadd.xlane.f32.xlu1 %v3104_v22  ;;  %v3313_v22 = vld [vmem:[%s4900_s16] sm:$0x1] }
0x1ebf   : > { %v3106_v28 = vpop.xlane.xlu1 %3105 }
0x1ec0   : > { %v3107_v29 = vmul.f32 0.03125, %v3106_v28 }
0x1ec2   : > { %v3108_v30 = vadd.f32 1e-12, %v3107_v29 }
0x1ec4   : > { %4061 = vrsqrt.f32 %v3108_v30 }
0x1ece   : > { %v4062_v31 = vpop.eup %4061 }
0x1ecf   : > { %v3110_v33 = vmul.f32 %v4062_v31, %v3102_v20 }
0x1ed1   : > { %v3117_v35 = vmul.f32 %v3548_v32, %v3110_v33 }
0x1ed3   : > { %v3124_v36 = vadd.f32 %v3549_v34, %v3117_v35 }
0x1ed5   : > { %3845 = vmatmul.mubr.msk.f32.vlgmr.msra.gmra.mrb[40].mxu1 %vm712_vm2, %v3124_v36 }
0x1ed6   : > { %3874 = vmatprep.mubr.msk.f32.mxu1 %vm4133_vm3, %v4132_v38  ;;  %v3560_v38 = vld [vmem:[%s4897_s13 + $0x58] sm:$0xff]  ;;  %3963 = vmatpush3.bf16.msra.mxu1 %v3962_v12 }
0x1ed7   : > { %v3953_v42 = vpack.c.bf16 %v3560_v38, %v3559_v41  ;;  %3964 = vmatprep.subr.bf16.mxu1 %v4131_v3 }
0x1ed9   : > { %3954 = vmatpush3.bf16.msra.mxu0 %v3953_v42 }
0x1eda   : > { %3955 = vmatprep.subr.bf16.mxu0 %v4131_v3 }
0x1edd   : > { %3957 = vmatpush3.bf16.msra.mxu0 %v3956_v43 }
0x1ede   : > { %3958 = vmatprep.subr.bf16.mxu0 %v4131_v3  ;;  %v3312_v3 = vld [vmem:[%s4899_s15] sm:$0x1] }
0x1ee1   : > { %3960 = vmatpush3.bf16.msra.mxu0 %v3959_v48 }
0x1fa8   : > { %v3207_v50 = vpop.f32.mrb[40].mxu1 }
0x1fa9   : > { %v3208_v52 = vadd.f32 %v3555_v49, %v3207_v50  ;;  %v3846_v53 = vpop.f32.mrb[41].mxu1 }
0x1fab   : > { %v3211_v54 = vmul.f32 %v3208_v52, %v3208_v52 }
0x1fad   : > { %v3212_v55 = vmul.f32 %v3211_v54, %v3208_v52 }
0x1faf   : > { %v3213_v56 = vmul.f32 0.044715, %v3212_v55 }
0x1fb1   : > { %v3214_v57 = vadd.f32 %v3213_v56, %v3208_v52 }
0x1fb3   : > { %v3215_v58 = vmul.f32 0.7978846, %v3214_v57 }
0x1fb5   : > { %4063 = vtanh.f32 %v3215_v58 }
0x1fbf   : > { %v4064_v59 = vpop.eup %4063 }
0x1fc0   : > { %v3217_v60 = vadd.f32 1.0, %v4064_v59 }
0x1fc2   : > { %v3218_v61 = vmul.f32 0.5, %v3217_v60 }
0x1fc4   : > { %v3219_v62 = vmul.f32 %v3218_v61, %v3208_v52 }
0x1fc6   : > { %3864 = vmatmul.mubr.msk.f32.vlgmr.msra.gmra.mrb[18].mxu0 %vm1924_vm6, %v3219_v62 }
0x2099   : > { %v3298_v63 = vpop.f32.mrb[18].mxu0 }
0x209a   : > { %v3302_v13 = vadd.f32 %v3298_v63, %v4750_v16  ;;  %v3865_v1 = vpop.f32.mrb[19].mxu0  ;;  %v3965_v16 = vpack.c.bf16 %v3333_v15, %v3332_v14 }
0x209c   : > { %v3311_v2 = vadd.f32 %v3567_v0, %v3302_v13  ;;  %3966 = vmatpush3.bf16.msra.mxu1 %v3965_v16 }
0x209e   : > { %v3315_v4 = vsel %vm3314_vm7, %v3311_v2, 0.0 }
0x209f   : > { %3316 = vadd.xlane.f32.xlu1 %v3315_v4 }
0x212c   : > { %v3317_v6 = vpop.xlane.xlu1 %3316 }
0x212d   : > { %v3318_v7 = vmul.f32 0.03125, %v3317_v6 }
0x212f   : > { %v3319_v8 = vsub.f32 %v3311_v2, %v3318_v7 }
0x2131   : > { %v3320_v51 = vmul.f32 %v3319_v8, %v3319_v8 }
0x2133   : > { %v3321_v9 = vsel %vm3314_vm7, %v3320_v51, 0.0 }
0x2134   : > { %3322 = vadd.xlane.f32.xlu1 %v3321_v9 }
0x21c1   : > { %v3323_v17 = vpop.xlane.xlu1 %3322 }
0x21c2   : > { %v3324_v18 = vmul.f32 0.03125, %v3323_v17 }
0x21c4   : > { %v3325_v19 = vadd.f32 1e-12, %v3324_v18 }
0x21c6   : > { %4065 = vrsqrt.f32 %v3325_v19 }
0x21d0   : > { %v4066_v20 = vpop.eup %4065 }
0x21d1   : > { %v3327_v21 = vmul.f32 %v4066_v20, %v3319_v8 }
0x21d3   : > { %v3328_v23 = vmul.f32 %v3327_v21, %v3312_v3 }
0x21d5   : > { %v3329_v5 = vadd.f32 %v3328_v23, %v3313_v22 }
0x21d7   : > { %3875 = vmatmul.mubr.msk.f32.vlgmr.msra.gmra.mrb[42].mxu1 %vm712_vm2, %v3329_v5 }
0x22aa   : > { %v3404_v25 = vpop.f32.mrb[42].mxu1 }
0x22ab   : > { %v3405_v26 = vadd.f32 %v3404_v25, %v3334_v24  ;;  %v3876_v27 = vpop.f32.mrb[43].mxu1 }
0x22ad   : > { %3409 = vst.msk [vmem:[%s594_s20] sm:$0x1] %vm3408_vm8, %v3405_v26 }
0x22ae   : > { %4080 = shalt.err (!%p4077_p3)
}
0x22af   : > { %s4081_s27 = scalar_lea.hbm %s4842_s24, 16  ;;  %s4085_s28 = scalar_lea.hbm %s4951_s19, 32 }
0x22b0   : > { %p4082_p4 = scmp.ne.s32.totalorder %s4842_s24, %s4081_s27  ;;  %p4086_p9 = scmp.lt.u32.totalorder %s4842_s24, %s4951_s19 }
0x22b1   : > { %p4087_p10 = scmp.lt.u32.totalorder %s4085_s28, %s4081_s27  ;;  %p4089_p12 = scmp.lt.u32.totalorder %s4081_s27, %s4842_s24 }
0x22b2   : > { %p4083_p7 = pnand %p4082_p4, %p4285_p5 }
0x22b3   : > { %p4088_p11 = por %p4087_p10, %p4086_p9 }
0x22b4   : > { %p4084_p8 = pneg %p4083_p7 }
0x22b5   : > { %p4090_p13 = por %p4089_p12, %p4088_p11 }
0x22b7   : > { %p4091_p0 = pnand %p4090_p13, %p4084_p8 }
0x22b9   : > { %4094 = shalt.err (!%p4091_p0)
}
0x22ba   : > { %3967 = dma.vmem_to_hbm [thread:$0]  (%p4285_p5), %s4844_s2, 16, %s4842_s24, %s3411_s23  }
0x22bb PF: > { %s4952_s5 = sld [smem:[#allocation7_spill]]  ;;  %s4953_s21 = sld [smem:[#allocation5_spill]] }
0x22c1   : > { %p3973_p1 = scmp.ge.s32.totalorder %s4952_s5, 2  ;;  %s3435_s1 = sand.u32 1, %s4953_s21  }
0x22c2   : > { %s3436_s26 = scalar_lea.sflag [#allocation3], %s3435_s1 }
0x22c3   : > { %p3970_p2 = pnand %p3973_p1, %p4289_p6 }
0x22c5   : > { %4112 = dma.done.wait (!%p3970_p2), %s3436_s26, 16  }
0x22c6   : > { %4114 = vsyncadd (!%p3970_p2), %s3436_s26, 4294967280  ;;  %s4955_s21 = sld [smem:[#allocation8_spill]]  ;;  %s4956_s27 = sld [smem:[#allocation6_spill]] }
0x22c7   : > { %s4957_s20 = sld [smem:[#allocation9_spill]]  ;;  %s4958_s0 = smov %s4121_s30 }
0x22cc   : > { %p29_p3 = scmp.ge.s32.totalorder %s4955_s21, 4   ;;  %s4959_s30 = smov %s4956_s27 }
0x22ce   :  { %31 = sbr.rel (!%p29_p3) target bundleno = 11 (0xb), region = 143 }
0x22d5   :  { %3440 = vsyncpa [#allocation3], 1 }
0x22d6   :  { %3442 = vsyncpa [#allocation3 + $0x1], 1 }

</bundles_post_ra>
